<compile_context>
chip_gen: v6e
topology: v6e:2x2x1
jax: 0.10.0
libtpu: 0.0.40
codegen_flags: <defaults>
</compile_context>

<pallas_src>
import math

import jax
import jax.numpy as jnp
import numpy as np
from jax import lax
from jax.experimental import pallas as pl
from jax.experimental.pallas import tpu as pltpu


def _round_up(v, m):
    return -(-v // m) * m


def _make_bottleneck_kernel(H, W, dilation, pw):
    d = dilation
    PH = H + 2 * d
    PW = pw                      # >= W + d, multiple of 16
    HW = H * W
    NROW = H * PW                # rows of the padded-width frame

    def kernel(x_ref, w1_ref, w2_ref, w3_ref, b1_ref, b2_ref, b3_ref,
               out_ref, pad_ref):
        cmid = w1_ref.shape[1]
        cdt = pad_ref.dtype                      # matmul operand dtype (bf16)

        # ---- conv_1_1x1 (+ folded bn_1 scale) + bias + relu ----------------
        o1 = jnp.dot(x_ref[...].astype(cdt), w1_ref[...],
                     preferred_element_type=jnp.float32)
        o1 = jnp.maximum(o1 + b1_ref[...], 0.0)

        # ---- build the zero-bordered conv2 input in the bf16 scratch -------
        # Image at rows [d, d+H), columns [0, W); columns [W, PW) and the
        # top/bottom d rows are zeros and double as the conv zero padding
        # (left-border taps wrap circularly into the zero columns below).
        # Zeroing is done every grid step (NOT pl.when(pid == 0)) so it stays
        # correct when the "parallel" batch axis is sharded across
        # TensorCores (per-core scratch VMEM is uninitialized).
        pad_ref[0:d, :, :] = jnp.zeros((d, PW, cmid), cdt)
        pad_ref[PH - d:PH, :, :] = jnp.zeros((d, PW, cmid), cdt)
        pad_ref[d:d + H, W:PW, :] = jnp.zeros((H, PW - W, cmid), cdt)
        pad_ref[d:d + H, 0:W, :] = o1.reshape(H, W, cmid).astype(cdt)

        # ---- conv_2_3x3 (stride=1, dilation=d): 9 full-width matmuls -------
        # Contiguous leading-dim slabs -> free reshape; column shifts via
        # pltpu.roll on the f32 partial sums (grouped per kx: 2 rolls/step);
        # interior W columns cropped once at the end.
        slabs = [pad_ref[ky * d:ky * d + H, :, :].reshape(NROW, cmid)
                 for ky in range(3)]
        acc = None
        for kx in range(3):
            grp = None
            for ky in range(3):
                contrib = jnp.dot(slabs[ky], w2_ref[ky * 3 + kx],
                                  preferred_element_type=jnp.float32)
                grp = contrib if grp is None else grp + contrib
            shift = (-(kx - 1) * d) % NROW       # static python int
            if shift:
                grp = pltpu.roll(grp, shift, axis=0)
            acc = grp if acc is None else acc + grp

        # NOTE: demo shapes keep W a multiple of 8 so this crop/reshape is
        # tile-aligned; for W % 8 != 0 (e.g. DRN W=28) it costs one relayout
        # per step — still far less than the 9 per-tap relayouts it replaces.
        o2 = acc.reshape(H, PW, cmid)[:, 0:W, :].reshape(HW, cmid)
        o2 = jnp.maximum(o2 + b2_ref[...], 0.0)

        # ---- conv_3_1x1 (+ folded bn_3 scale) + bias + residual + relu -----
        o3 = jnp.dot(o2.astype(cdt), w3_ref[...],
                     preferred_element_type=jnp.float32)
        o3 = o3 + b3_ref[...] + x_ref[...]
        out_ref[...] = jnp.maximum(o3, 0.0).astype(out_ref.dtype)

    return kernel


def bottleneck_pallas(x_nchw, p, dilation=1, eps=1e-5,
                      compute_dtype=jnp.bfloat16):
    N, Cin, H, W = x_nchw.shape
    Cmid = p['w1'].shape[0]
    Cout = p['w3'].shape[0]
    assert Cout == Cin, "residual path requires in_channel == 4*out_channel"
    d = dilation
    assert d >= 1
    LANE = 128
    Cin_p = _round_up(Cin, LANE)
    Cmid_p = _round_up(Cmid, LANE)
    Cout_p = _round_up(Cout, LANE)
    PH = H + 2 * d
    PW = _round_up(W + d, 16)       # multiple of 16 -> bf16-tile-aligned slabs

    # NCHW -> NHWC -> (N, H*W, C); keep x in f32 (exact residual add) and
    # zero-pad channels to the lane width.
    x = jnp.transpose(x_nchw, (0, 2, 3, 1)).reshape(N, H * W, Cin)
    x = x.astype(jnp.float32)
    if Cin_p != Cin:
        x = jnp.pad(x, ((0, 0), (0, 0), (0, Cin_p - Cin)))

    # Fold eval-mode BN: scale into weight output columns, bias stays f32.
    def fold(g, b, m, v):
        s = g / jnp.sqrt(v + eps)
        return s, b - m * s

    s1, b1 = fold(p['g1'], p['b1'], p['m1'], p['v1'])
    s2, b2 = fold(p['g2'], p['b2'], p['m2'], p['v2'])
    s3, b3 = fold(p['g3'], p['b3'], p['m3'], p['v3'])

    # torch OIHW weights -> matmul form (in, out), BN scales folded,
    # channel dims zero-padded to the lane width, cast to bf16.
    w1 = jnp.transpose(p['w1'][:, :, 0, 0], (1, 0)) * s1[None, :]   # (Cin, Cmid)
    w2 = (jnp.transpose(p['w2'], (2, 3, 1, 0)).reshape(9, Cmid, Cmid)
          * s2[None, None, :])                                      # (9, Cmid, Cmid)
    w3 = jnp.transpose(p['w3'][:, :, 0, 0], (1, 0)) * s3[None, :]   # (Cmid, Cout)

    w1 = jnp.pad(w1, ((0, Cin_p - Cin), (0, Cmid_p - Cmid))).astype(compute_dtype)
    w2 = jnp.pad(w2, ((0, 0), (0, Cmid_p - Cmid),
                      (0, Cmid_p - Cmid))).astype(compute_dtype)
    w3 = jnp.pad(w3, ((0, Cmid_p - Cmid), (0, Cout_p - Cout))).astype(compute_dtype)

    b1 = jnp.pad(b1, (0, Cmid_p - Cmid)).reshape(1, Cmid_p).astype(jnp.float32)
    b2 = jnp.pad(b2, (0, Cmid_p - Cmid)).reshape(1, Cmid_p).astype(jnp.float32)
    b3 = jnp.pad(b3, (0, Cout_p - Cout)).reshape(1, Cout_p).astype(jnp.float32)

    kernel = _make_bottleneck_kernel(H, W, d, PW)

    def full(shape):
        return pl.BlockSpec(shape, lambda n: (0,) * len(shape))

    out2d = pl.pallas_call(
        kernel,
        out_shape=jax.ShapeDtypeStruct((N, H * W, Cout_p), jnp.float32),
        grid_spec=pltpu.PrefetchScalarGridSpec(
            num_scalar_prefetch=0,
            grid=(N,),
            in_specs=[
                pl.BlockSpec((pl.Squeezed(), H * W, Cin_p), lambda n: (n, 0, 0)),
                full((Cin_p, Cmid_p)),
                full((9, Cmid_p, Cmid_p)),
                full((Cmid_p, Cout_p)),
                full((1, Cmid_p)), full((1, Cmid_p)), full((1, Cout_p)),
            ],
            out_specs=pl.BlockSpec((pl.Squeezed(), H * W, Cout_p),
                                   lambda n: (n, 0, 0)),
            scratch_shapes=[pltpu.VMEM((PH, PW, Cmid_p), compute_dtype)],
        ),
        compiler_params=pltpu.CompilerParams(
            dimension_semantics=("parallel",)),
    )(x, w1, w2, w3, b1, b2, b3)

    out = out2d[..., :Cout].reshape(N, H, W, Cout)
    return jnp.transpose(out, (0, 3, 1, 2))   # back to NCHW


# ---------------- pure-JAX reference (for correctness check) ----------------
def _conv2d(x, w, stride=1, padding=0, dilation=1):
    return lax.conv_general_dilated(
        x, w, window_strides=(stride, stride),
        padding=[(padding, padding), (padding, padding)],
        rhs_dilation=(dilation, dilation),
        dimension_numbers=('NCHW', 'OIHW', 'NCHW'),
        precision=lax.Precision.HIGHEST)


def bottleneck_ref(x, p, dilation=1, eps=1e-5):
    def bn(y, g, b, m, v):
        sh = (1, -1, 1, 1)
        return ((y - m.reshape(sh)) / jnp.sqrt(v.reshape(sh) + eps)
                * g.reshape(sh) + b.reshape(sh))

    out = _conv2d(x, p['w1'])
    out = jax.nn.relu(bn(out, p['g1'], p['b1'], p['m1'], p['v1']))
    out = _conv2d(out, p['w2'], stride=1, padding=dilation, dilation=dilation)
    out = jax.nn.relu(bn(out, p['g2'], p['b2'], p['m2'], p['v2']))
    out = _conv2d(out, p['w3'])
    out = bn(out, p['g3'], p['b3'], p['m3'], p['v3'])
    return jax.nn.relu(out + x)


# ---------------- deterministic parameter init ----------------
def init_params(key, in_channel, out_channel):
    ks = jax.random.split(key, 15)

    def conv_w(k, shape):
        fan_in = shape[1] * shape[2] * shape[3]
        return jax.random.normal(k, shape, jnp.float32) * math.sqrt(2.0 / fan_in)

    p = {
        'w1': conv_w(ks[0], (out_channel, in_channel, 1, 1)),
        'w2': conv_w(ks[1], (out_channel, out_channel, 3, 3)),
        'w3': conv_w(ks[2], (4 * out_channel, out_channel, 1, 1)),
    }
    chans = {1: out_channel, 2: out_channel, 3: 4 * out_channel}
    k = 3
    for i in (1, 2, 3):
        c = chans[i]
        p[f'g{i}'] = 1.0 + 0.1 * jax.random.normal(ks[k + 0], (c,), jnp.float32)
        p[f'b{i}'] = 0.1 * jax.random.normal(ks[k + 1], (c,), jnp.float32)
        p[f'm{i}'] = 0.05 * jax.random.normal(ks[k + 2], (c,), jnp.float32)
        p[f'v{i}'] = 1.0 + 0.1 * jnp.abs(jax.random.normal(ks[k + 3], (c,), jnp.float32))
        k += 4
    return p


if __name__ == "__main__":
    in_channel, out_channel = 32, 8     # residual needs in_channel == 4*out_channel
    N, H, W = 2, 8, 8
    key = jax.random.PRNGKey(0)
    kx_, kp = jax.random.split(key)
    x = jax.random.normal(kx_, (N, in_channel, H, W), jnp.float32)
    params = init_params(kp, in_channel, out_channel)

    # Check both the non-dilated and a dilated instantiation (exercises the
    # roll-based tap alignment with d=1 and d=2).
    for dil in (1, 2):
        out = jax.block_until_ready(bottleneck_pallas(x, params, dilation=dil))
        ref = bottleneck_ref(x, params, dilation=dil)
        out_np, ref_np = np.asarray(out), np.asarray(ref)
        # Tolerance loosened vs. pure-f32: matmul operands are bf16 (f32
        # accumulate) and three stacked convs accumulate rounding error.
        if not np.allclose(out_np, ref_np, atol=5e-2, rtol=5e-2):
            raise AssertionError(
                f"dilation={dil}: max abs err = "
                f"{np.max(np.abs(out_np - ref_np))}")
    print("KERNEL_OK")
</pallas_src>

<mosaic_0001>
module attributes {stable_mosaic.version = 11 : i64} {
  func.func @kernel(%arg0: i32, %arg1: memref<1x64x128xf32, #tpu.memory_space<vmem>>, %arg2: memref<128x128xbf16, #tpu.memory_space<vmem>>, %arg3: memref<9x128x128xbf16, #tpu.memory_space<vmem>>, %arg4: memref<128x128xbf16, #tpu.memory_space<vmem>>, %arg5: memref<1x128xf32, #tpu.memory_space<vmem>>, %arg6: memref<1x128xf32, #tpu.memory_space<vmem>>, %arg7: memref<1x128xf32, #tpu.memory_space<vmem>>, %arg8: memref<1x64x128xf32, #tpu.memory_space<vmem>>, %arg9: memref<10x16x128xbf16, #tpu.memory_space<vmem>>) attributes {dimension_semantics = [#tpu.dimension_semantics<parallel>], iteration_bounds = array<i64: 2>, scalar_prefetch = 0 : i64, scratch_operands = 1 : i64, tpu.core_type = #tpu.core_type<tc>, window_params = [{transform_indices = @transform_0, window_bounds = array<i64: 1, 64, 128>}, {pipeline_mode = #tpu.pipeline_mode<synchronous>, transform_indices = @transform_1, window_bounds = array<i64: 128, 128>}, {pipeline_mode = #tpu.pipeline_mode<synchronous>, transform_indices = @transform_2, window_bounds = array<i64: 9, 128, 128>}, {pipeline_mode = #tpu.pipeline_mode<synchronous>, transform_indices = @transform_3, window_bounds = array<i64: 128, 128>}, {pipeline_mode = #tpu.pipeline_mode<synchronous>, transform_indices = @transform_4, window_bounds = array<i64: 1, 128>}, {pipeline_mode = #tpu.pipeline_mode<synchronous>, transform_indices = @transform_5, window_bounds = array<i64: 1, 128>}, {pipeline_mode = #tpu.pipeline_mode<synchronous>, transform_indices = @transform_6, window_bounds = array<i64: 1, 128>}, {transform_indices = @transform_7, window_bounds = array<i64: 1, 64, 128>}]} {
    %c0 = arith.constant 0 : index
    %c0_0 = arith.constant 0 : index
    %c0_1 = arith.constant 0 : index
    %0 = vector.load %arg1[%c0, %c0_0, %c0_1] : memref<1x64x128xf32, #tpu.memory_space<vmem>>, vector<1x64x128xf32>
    %1 = vector.shape_cast %0 : vector<1x64x128xf32> to vector<64x128xf32>
    %2 = arith.truncf %1 : vector<64x128xf32> to vector<64x128xbf16>
    %c0_2 = arith.constant 0 : index
    %c0_3 = arith.constant 0 : index
    %3 = vector.load %arg2[%c0_2, %c0_3] : memref<128x128xbf16, #tpu.memory_space<vmem>>, vector<128x128xbf16>
    %cst = arith.constant dense<0.000000e+00> : vector<64x128xf32>
    %4 = tpu.matmul %2, %3, %cst {dimension_numbers = #tpu.dot_dimension_numbers<[1], [0], [0], [1], [0, 0, 1, 1], [], []>} : vector<64x128xbf16>, vector<128x128xbf16>, vector<64x128xf32> -> vector<64x128xf32>
    %c0_4 = arith.constant 0 : index
    %c0_5 = arith.constant 0 : index
    %5 = vector.load %arg5[%c0_4, %c0_5] : memref<1x128xf32, #tpu.memory_space<vmem>>, vector<1x128xf32>
    %6 = vector.broadcast %5 : vector<1x128xf32> to vector<64x128xf32>
    %7 = arith.addf %4, %6 : vector<64x128xf32>
    %cst_6 = arith.constant 0.000000e+00 : f32
    %8 = vector.broadcast %cst_6 : f32 to vector<64x128xf32>
    %9 = arith.maximumf %7, %8 : vector<64x128xf32>
    %cst_7 = arith.constant 0.000000e+00 : bf16
    %10 = vector.broadcast %cst_7 : bf16 to vector<1x16x128xbf16>
    %c0_8 = arith.constant 0 : index
    %c0_9 = arith.constant 0 : index
    %c0_10 = arith.constant 0 : index
    %11 = vector.load %arg9[%c0_8, %c0_9, %c0_10] : memref<10x16x128xbf16, #tpu.memory_space<vmem>>, vector<1x16x128xbf16>
    tpu.vector_store %arg9[%c0_8, %c0_9, %c0_10], %10 {strides = array<i32>} : memref<10x16x128xbf16, #tpu.memory_space<vmem>>, vector<1x16x128xbf16>,
    %cst_11 = arith.constant 0.000000e+00 : bf16
    %12 = vector.broadcast %cst_11 : bf16 to vector<1x16x128xbf16>
    %c9 = arith.constant 9 : index
    %c0_12 = arith.constant 0 : index
    %c0_13 = arith.constant 0 : index
    %13 = vector.load %arg9[%c9, %c0_12, %c0_13] : memref<10x16x128xbf16, #tpu.memory_space<vmem>>, vector<1x16x128xbf16>
    tpu.vector_store %arg9[%c9, %c0_12, %c0_13], %12 {strides = array<i32>} : memref<10x16x128xbf16, #tpu.memory_space<vmem>>, vector<1x16x128xbf16>,
    %cst_14 = arith.constant 0.000000e+00 : bf16
    %14 = vector.broadcast %cst_14 : bf16 to vector<8x8x128xbf16>
    %c1 = arith.constant 1 : index
    %c8 = arith.constant 8 : index
    %c0_15 = arith.constant 0 : index
    %15 = vector.load %arg9[%c1, %c8, %c0_15] : memref<10x16x128xbf16, #tpu.memory_space<vmem>>, vector<8x8x128xbf16>
    tpu.vector_store %arg9[%c1, %c8, %c0_15], %14 {strides = array<i32>} : memref<10x16x128xbf16, #tpu.memory_space<vmem>>, vector<8x8x128xbf16>,
    %16 = vector.shape_cast %9 : vector<64x128xf32> to vector<8x8x128xf32>
    %17 = arith.truncf %16 : vector<8x8x128xf32> to vector<8x8x128xbf16>
    %c1_16 = arith.constant 1 : index
    %c0_17 = arith.constant 0 : index
    %c0_18 = arith.constant 0 : index
    %18 = vector.load %arg9[%c1_16, %c0_17, %c0_18] : memref<10x16x128xbf16, #tpu.memory_space<vmem>>, vector<8x8x128xbf16>
    tpu.vector_store %arg9[%c1_16, %c0_17, %c0_18], %17 {strides = array<i32>} : memref<10x16x128xbf16, #tpu.memory_space<vmem>>, vector<8x8x128xbf16>,
    %c0_19 = arith.constant 0 : index
    %c0_20 = arith.constant 0 : index
    %c0_21 = arith.constant 0 : index
    %19 = vector.load %arg9[%c0_19, %c0_20, %c0_21] : memref<10x16x128xbf16, #tpu.memory_space<vmem>>, vector<8x16x128xbf16>
    %20 = vector.shape_cast %19 : vector<8x16x128xbf16> to vector<128x128xbf16>
    %c1_22 = arith.constant 1 : index
    %c0_23 = arith.constant 0 : index
    %c0_24 = arith.constant 0 : index
    %21 = vector.load %arg9[%c1_22, %c0_23, %c0_24] : memref<10x16x128xbf16, #tpu.memory_space<vmem>>, vector<8x16x128xbf16>
    %22 = vector.shape_cast %21 : vector<8x16x128xbf16> to vector<128x128xbf16>
    %c2 = arith.constant 2 : index
    %c0_25 = arith.constant 0 : index
    %c0_26 = arith.constant 0 : index
    %23 = vector.load %arg9[%c2, %c0_25, %c0_26] : memref<10x16x128xbf16, #tpu.memory_space<vmem>>, vector<8x16x128xbf16>
    %24 = vector.shape_cast %23 : vector<8x16x128xbf16> to vector<128x128xbf16>
    %c0_27 = arith.constant 0 : index
    %c0_28 = arith.constant 0 : index
    %c0_29 = arith.constant 0 : index
    %25 = vector.load %arg3[%c0_27, %c0_28, %c0_29] : memref<9x128x128xbf16, #tpu.memory_space<vmem>>, vector<1x128x128xbf16>
    %26 = vector.shape_cast %25 : vector<1x128x128xbf16> to vector<128x128xbf16>
    %cst_30 = arith.constant dense<0.000000e+00> : vector<128x128xf32>
    %27 = tpu.matmul %20, %26, %cst_30 {dimension_numbers = #tpu.dot_dimension_numbers<[1], [0], [0], [1], [0, 0, 1, 1], [], []>} : vector<128x128xbf16>, vector<128x128xbf16>, vector<128x128xf32> -> vector<128x128xf32>
    %c3 = arith.constant 3 : index
    %c0_31 = arith.constant 0 : index
    %c0_32 = arith.constant 0 : index
    %28 = vector.load %arg3[%c3, %c0_31, %c0_32] : memref<9x128x128xbf16, #tpu.memory_space<vmem>>, vector<1x128x128xbf16>
    %29 = vector.shape_cast %28 : vector<1x128x128xbf16> to vector<128x128xbf16>
    %cst_33 = arith.constant dense<0.000000e+00> : vector<128x128xf32>
    %30 = tpu.matmul %22, %29, %cst_33 {dimension_numbers = #tpu.dot_dimension_numbers<[1], [0], [0], [1], [0, 0, 1, 1], [], []>} : vector<128x128xbf16>, vector<128x128xbf16>, vector<128x128xf32> -> vector<128x128xf32>
    %31 = arith.addf %27, %30 : vector<128x128xf32>
    %c6 = arith.constant 6 : index
    %c0_34 = arith.constant 0 : index
    %c0_35 = arith.constant 0 : index
    %32 = vector.load %arg3[%c6, %c0_34, %c0_35] : memref<9x128x128xbf16, #tpu.memory_space<vmem>>, vector<1x128x128xbf16>
    %33 = vector.shape_cast %32 : vector<1x128x128xbf16> to vector<128x128xbf16>
    %cst_36 = arith.constant dense<0.000000e+00> : vector<128x128xf32>
    %34 = tpu.matmul %24, %33, %cst_36 {dimension_numbers = #tpu.dot_dimension_numbers<[1], [0], [0], [1], [0, 0, 1, 1], [], []>} : vector<128x128xbf16>, vector<128x128xbf16>, vector<128x128xf32> -> vector<128x128xf32>
    %35 = arith.addf %31, %34 : vector<128x128xf32>
    %c1_i32 = arith.constant 1 : i32
    %36 = tpu.dynamic_rotate %35 by %c1_i32 dim 0 : vector<128x128xf32>, i32 -> vector<128x128xf32>
    %c1_37 = arith.constant 1 : index
    %c0_38 = arith.constant 0 : index
    %c0_39 = arith.constant 0 : index
    %37 = vector.load %arg3[%c1_37, %c0_38, %c0_39] : memref<9x128x128xbf16, #tpu.memory_space<vmem>>, vector<1x128x128xbf16>
    %38 = vector.shape_cast %37 : vector<1x128x128xbf16> to vector<128x128xbf16>
    %cst_40 = arith.constant dense<0.000000e+00> : vector<128x128xf32>
    %39 = tpu.matmul %20, %38, %cst_40 {dimension_numbers = #tpu.dot_dimension_numbers<[1], [0], [0], [1], [0, 0, 1, 1], [], []>} : vector<128x128xbf16>, vector<128x128xbf16>, vector<128x128xf32> -> vector<128x128xf32>
    %c4 = arith.constant 4 : index
    %c0_41 = arith.constant 0 : index
    %c0_42 = arith.constant 0 : index
    %40 = vector.load %arg3[%c4, %c0_41, %c0_42] : memref<9x128x128xbf16, #tpu.memory_space<vmem>>, vector<1x128x128xbf16>
    %41 = vector.shape_cast %40 : vector<1x128x128xbf16> to vector<128x128xbf16>
    %cst_43 = arith.constant dense<0.000000e+00> : vector<128x128xf32>
    %42 = tpu.matmul %22, %41, %cst_43 {dimension_numbers = #tpu.dot_dimension_numbers<[1], [0], [0], [1], [0, 0, 1, 1], [], []>} : vector<128x128xbf16>, vector<128x128xbf16>, vector<128x128xf32> -> vector<128x128xf32>
    %43 = arith.addf %39, %42 : vector<128x128xf32>
    %c7 = arith.constant 7 : index
    %c0_44 = arith.constant 0 : index
    %c0_45 = arith.constant 0 : index
    %44 = vector.load %arg3[%c7, %c0_44, %c0_45] : memref<9x128x128xbf16, #tpu.memory_space<vmem>>, vector<1x128x128xbf16>
    %45 = vector.shape_cast %44 : vector<1x128x128xbf16> to vector<128x128xbf16>
    %cst_46 = arith.constant dense<0.000000e+00> : vector<128x128xf32>
    %46 = tpu.matmul %24, %45, %cst_46 {dimension_numbers = #tpu.dot_dimension_numbers<[1], [0], [0], [1], [0, 0, 1, 1], [], []>} : vector<128x128xbf16>, vector<128x128xbf16>, vector<128x128xf32> -> vector<128x128xf32>
    %47 = arith.addf %43, %46 : vector<128x128xf32>
    %48 = arith.addf %36, %47 : vector<128x128xf32>
    %c2_47 = arith.constant 2 : index
    %c0_48 = arith.constant 0 : index
    %c0_49 = arith.constant 0 : index
    %49 = vector.load %arg3[%c2_47, %c0_48, %c0_49] : memref<9x128x128xbf16, #tpu.memory_space<vmem>>, vector<1x128x128xbf16>
    %50 = vector.shape_cast %49 : vector<1x128x128xbf16> to vector<128x128xbf16>
    %cst_50 = arith.constant dense<0.000000e+00> : vector<128x128xf32>
    %51 = tpu.matmul %20, %50, %cst_50 {dimension_numbers = #tpu.dot_dimension_numbers<[1], [0], [0], [1], [0, 0, 1, 1], [], []>} : vector<128x128xbf16>, vector<128x128xbf16>, vector<128x128xf32> -> vector<128x128xf32>
    %c5 = arith.constant 5 : index
    %c0_51 = arith.constant 0 : index
    %c0_52 = arith.constant 0 : index
    %52 = vector.load %arg3[%c5, %c0_51, %c0_52] : memref<9x128x128xbf16, #tpu.memory_space<vmem>>, vector<1x128x128xbf16>
    %53 = vector.shape_cast %52 : vector<1x128x128xbf16> to vector<128x128xbf16>
    %cst_53 = arith.constant dense<0.000000e+00> : vector<128x128xf32>
    %54 = tpu.matmul %22, %53, %cst_53 {dimension_numbers = #tpu.dot_dimension_numbers<[1], [0], [0], [1], [0, 0, 1, 1], [], []>} : vector<128x128xbf16>, vector<128x128xbf16>, vector<128x128xf32> -> vector<128x128xf32>
    %55 = arith.addf %51, %54 : vector<128x128xf32>
    %c8_54 = arith.constant 8 : index
    %c0_55 = arith.constant 0 : index
    %c0_56 = arith.constant 0 : index
    %56 = vector.load %arg3[%c8_54, %c0_55, %c0_56] : memref<9x128x128xbf16, #tpu.memory_space<vmem>>, vector<1x128x128xbf16>
    %57 = vector.shape_cast %56 : vector<1x128x128xbf16> to vector<128x128xbf16>
    %cst_57 = arith.constant dense<0.000000e+00> : vector<128x128xf32>
    %58 = tpu.matmul %24, %57, %cst_57 {dimension_numbers = #tpu.dot_dimension_numbers<[1], [0], [0], [1], [0, 0, 1, 1], [], []>} : vector<128x128xbf16>, vector<128x128xbf16>, vector<128x128xf32> -> vector<128x128xf32>
    %59 = arith.addf %55, %58 : vector<128x128xf32>
    %c127_i32 = arith.constant 127 : i32
    %60 = tpu.dynamic_rotate %59 by %c127_i32 dim 0 : vector<128x128xf32>, i32 -> vector<128x128xf32>
    %61 = arith.addf %48, %60 : vector<128x128xf32>
    %62 = vector.shape_cast %61 : vector<128x128xf32> to vector<8x16x128xf32>
    %63 = vector.extract_strided_slice %62 {offsets = [0, 0, 0], sizes = [8, 8, 128], strides = [1, 1, 1]} : vector<8x16x128xf32> to vector<8x8x128xf32>
    %64 = vector.shape_cast %63 : vector<8x8x128xf32> to vector<64x128xf32>
    %c0_58 = arith.constant 0 : index
    %c0_59 = arith.constant 0 : index
    %65 = vector.load %arg6[%c0_58, %c0_59] : memref<1x128xf32, #tpu.memory_space<vmem>>, vector<1x128xf32>
    %66 = vector.broadcast %65 : vector<1x128xf32> to vector<64x128xf32>
    %67 = arith.addf %64, %66 : vector<64x128xf32>
    %cst_60 = arith.constant 0.000000e+00 : f32
    %68 = vector.broadcast %cst_60 : f32 to vector<64x128xf32>
    %69 = arith.maximumf %67, %68 : vector<64x128xf32>
    %70 = arith.truncf %69 : vector<64x128xf32> to vector<64x128xbf16>
    %c0_61 = arith.constant 0 : index
    %c0_62 = arith.constant 0 : index
    %71 = vector.load %arg4[%c0_61, %c0_62] : memref<128x128xbf16, #tpu.memory_space<vmem>>, vector<128x128xbf16>
    %cst_63 = arith.constant dense<0.000000e+00> : vector<64x128xf32>
    %72 = tpu.matmul %70, %71, %cst_63 {dimension_numbers = #tpu.dot_dimension_numbers<[1], [0], [0], [1], [0, 0, 1, 1], [], []>} : vector<64x128xbf16>, vector<128x128xbf16>, vector<64x128xf32> -> vector<64x128xf32>
    %c0_64 = arith.constant 0 : index
    %c0_65 = arith.constant 0 : index
    %73 = vector.load %arg7[%c0_64, %c0_65] : memref<1x128xf32, #tpu.memory_space<vmem>>, vector<1x128xf32>
    %74 = vector.broadcast %73 : vector<1x128xf32> to vector<64x128xf32>
    %75 = arith.addf %72, %74 : vector<64x128xf32>
    %c0_66 = arith.constant 0 : index
    %c0_67 = arith.constant 0 : index
    %c0_68 = arith.constant 0 : index
    %76 = vector.load %arg1[%c0_66, %c0_67, %c0_68] : memref<1x64x128xf32, #tpu.memory_space<vmem>>, vector<1x64x128xf32>
    %77 = vector.shape_cast %76 : vector<1x64x128xf32> to vector<64x128xf32>
    %78 = arith.addf %75, %77 : vector<64x128xf32>
    %cst_69 = arith.constant 0.000000e+00 : f32
    %79 = vector.broadcast %cst_69 : f32 to vector<64x128xf32>
    %80 = arith.maximumf %78, %79 : vector<64x128xf32>
    %c0_70 = arith.constant 0 : index
    %c0_71 = arith.constant 0 : index
    %c0_72 = arith.constant 0 : index
    %81 = vector.load %arg8[%c0_70, %c0_71, %c0_72] : memref<1x64x128xf32, #tpu.memory_space<vmem>>, vector<1x64x128xf32>
    %82 = vector.shape_cast %81 : vector<1x64x128xf32> to vector<64x128xf32>
    %83 = vector.shape_cast %80 : vector<64x128xf32> to vector<1x64x128xf32>
    tpu.vector_store %arg8[%c0_70, %c0_71, %c0_72], %83 {strides = array<i32>} : memref<1x64x128xf32, #tpu.memory_space<vmem>>, vector<1x64x128xf32>,
    return
  }
  func.func @transform_0(%arg0: i32) -> (i32, i32, i32) {
    %c0_i32 = arith.constant 0 : i32
    %c0_i32_0 = arith.constant 0 : i32
    %c0_i32_1 = arith.constant 0 : i32
    return %arg0, %c0_i32, %c0_i32_0 : i32, i32, i32
  }
  func.func @transform_1(%arg0: i32) -> (i32, i32) {
    %c0_i32 = arith.constant 0 : i32
    %c0_i32_0 = arith.constant 0 : i32
    %c0_i32_1 = arith.constant 0 : i32
    return %c0_i32, %c0_i32_0 : i32, i32
  }
  func.func @transform_2(%arg0: i32) -> (i32, i32, i32) {
    %c0_i32 = arith.constant 0 : i32
    %c0_i32_0 = arith.constant 0 : i32
    %c0_i32_1 = arith.constant 0 : i32
    %c0_i32_2 = arith.constant 0 : i32
    return %c0_i32, %c0_i32_0, %c0_i32_1 : i32, i32, i32
  }
  func.func @transform_3(%arg0: i32) -> (i32, i32) {
    %c0_i32 = arith.constant 0 : i32
    %c0_i32_0 = arith.constant 0 : i32
    %c0_i32_1 = arith.constant 0 : i32
    return %c0_i32, %c0_i32_0 : i32, i32
  }
  func.func @transform_4(%arg0: i32) -> (i32, i32) {
    %c0_i32 = arith.constant 0 : i32
    %c0_i32_0 = arith.constant 0 : i32
    %c0_i32_1 = arith.constant 0 : i32
    return %c0_i32, %c0_i32_0 : i32, i32
  }
  func.func @transform_5(%arg0: i32) -> (i32, i32) {
    %c0_i32 = arith.constant 0 : i32
    %c0_i32_0 = arith.constant 0 : i32
    %c0_i32_1 = arith.constant 0 : i32
    return %c0_i32, %c0_i32_0 : i32, i32
  }
  func.func @transform_6(%arg0: i32) -> (i32, i32) {
    %c0_i32 = arith.constant 0 : i32
    %c0_i32_0 = arith.constant 0 : i32
    %c0_i32_1 = arith.constant 0 : i32
    return %c0_i32, %c0_i32_0 : i32, i32
  }
  func.func @transform_7(%arg0: i32) -> (i32, i32, i32) {
    %c0_i32 = arith.constant 0 : i32
    %c0_i32_0 = arith.constant 0 : i32
    %c0_i32_1 = arith.constant 0 : i32
    return %arg0, %c0_i32, %c0_i32_0 : i32, i32, i32
  }
}

</mosaic_0001>

<bundles_post_ra>
// kernel: tpu_custom_call.1
= control target key start
LH: loop header
LB: loop body
LE: loop exit
PB: predicated region body
PF: predicated region fallthrough
CT: control target
= control target key end

     0   :  { %s4189_s0 = inlined_call_operand.hbm [shape: f32[2,64,128], index: 0, kind: input, shape index: {}]   ;;  %s4190_s1 = inlined_call_operand.hbm [shape: bf16[128,128], index: 1, kind: input, shape index: {}]   ;;  %s4191_s2 = inlined_call_operand.hbm [shape: bf16[9,128,128], index: 2, kind: input, shape index: {}]   ;;  %s4192_s3 = inlined_call_operand.hbm [shape: bf16[128,128], index: 3, kind: input, shape index: {}]   ;;  %s4193_s4 = inlined_call_operand.vmem [shape: f32[1,128], index: 4, kind: input, shape index: {}]   ;;  %s4194_s5 = inlined_call_operand.vmem [shape: f32[1,128], index: 5, kind: input, shape index: {}]   ;;  %s4195_s6 = inlined_call_operand.vmem [shape: f32[1,128], index: 6, kind: input, shape index: {}]   ;;  %s4196_s7 = inlined_call_operand.hbm [shape: f32[2,64,128], index: 7, kind: output, shape index: {}]  }
   0x1   :  { %4201 = sst [smem:[#allocation16_spill]] %s4190_s1 }
   0x2   :  { %12 = vsyncpa [#allocation4], 0 }
   0x3   :  { %14 = vsyncpa [#allocation4 + $0x1], 0 }
   0x4   :  { %15 = vsyncpa [#allocation7], 0 }
   0x5   :  { %16 = vsyncpa [#allocation10], 0 }
   0x6   :  { %17 = vsyncpa [#allocation5], 0 }
   0x7   :  { %19 = vsyncpa [#allocation5 + $0x1], 0  ;;  %s3658_s24 = smov 0   ;;  %s3660_s25 = smov 0  }
   0x8   :  { %s3662_s26 = smov 0   ;;  %s3664_s27 = smov 0  }
   0x9 LB: > { %s3679_s28 = sadd.s32 4294967295, %s3604_s27   ;;  %s2573_s29 = sadd.s32 4294967294, %s3604_s27   ;;  %s3604_s27 = sphi %s3664_s27, %s4222_s27   ;;  %s3600_s26 = sphi %s3662_s26, %s4221_s26   ;;  %s3596_s25 = sphi %s3660_s25, %s4220_s25   ;;  %s3592_s24 = sphi %s3658_s24, %s4219_s24  }
   0xa   : > { %p45_p0 = scmp.ne.s32.totalorder %s3596_s25, %s3592_s24  ;;  %p4197_p1 = scmp.eq.s32.totalorder %s3679_s28, 0 }
   0xb   : > { %p201_p3 = scmp.eq.s32.totalorder %s2573_s29, 1  ;;  %p2574_p5 = scmp.ge.s32.totalorder %s3604_s27, 1 }
   0xc   : > { %p3688_p4 = por %p4197_p1, %p45_p0  ;;  %p208_p7 = scmp.lt.s32.totalorder %s3604_s27, 3 }
   0xd   : > { %p3693_p6 = por %p201_p3, %p45_p0  ;;  %s3606_s10 = smov [#allocation6]  }
   0xe   : > { %s4202_s30 = scalar_select %p3688_p4, 1, 0 }
   0xf   : > { %s4203_s8 = scalar_select %p3693_p6, 1, 0 }
  0x10   : > { %p3698_p8 = pnand %p2574_p5, %p208_p7  ;;  %s220_s11 = sshll.u32 %s3606_s10, 4  ;;  %s221_s11 = int_to_ptr.vmem [resolvable:$true] %s220_s11 }
  0x11   : > { %s3607_s13 = smov [#allocation8]   ;;  %s3608_s15 = smov [#allocation9]  }
  0x12   : > { %s4204_s9 = scalar_select %p3698_p8, 1, 0 }
  0x13   : > { %p3246_p9 = pneg %p3698_p8  ;;  %s233_s14 = sshll.u32 %s3607_s13, 4  ;;  %s234_s14 = int_to_ptr.vmem [resolvable:$true] %s233_s14 }
  0x14   : > { %s246_s16 = sshll.u32 %s3608_s15, 4  ;;  %s3437_s17 = scalar_lea.vmem %s221_s11, 1024  ;;  %s247_s16 = int_to_ptr.vmem [resolvable:$true] %s246_s16 }
  0x15   : > { %p3707_p11 = pnand %p3246_p9, %p4197_p1  ;;  %p3438_p13 = scmp.ne.s32.totalorder %s221_s11, %s3437_s17 }
  0x16   : > { %p3445_p5 = scmp.lt.s32.totalorder %s221_s11, %s221_s11  ;;  %p3446_p7 = scmp.lt.s32.totalorder %s3437_s17, %s3437_s17 }
  0x17   : > { %p3428_p12 = pneg %p3707_p11 }
  0x18   : > { %p3447_p9 = por %p3446_p7, %p3445_p5 }
  0x19   : > { %p3440_p0 = pnand %p3438_p13, %p3428_p12 }
  0x1b   : > { %p3441_p3 = pneg %p3440_p0 }
  0x1d   : > { %p3448_p10 = pnand %p3447_p9, %p3441_p3 }
  0x1f   : > { %3451 = shalt.err (!%p3448_p10)
}
  0x20   : > { %s3609_s18 = smov 64   ;;  %s3610_s19 = smov 4  }
  0x21   : > { %s4206_s1 = sld [smem:[#allocation16_spill]]  ;;  %s3463_s22 = scalar_lea.vmem %s234_s14, 9216 }
  0x22   : > { %p3464_p1 = scmp.ne.s32.totalorder %s234_s14, %s3463_s22  ;;  %p3471_p2 = scmp.lt.s32.totalorder %s234_s14, %s234_s14 }
  0x23   : > { %p3472_p6 = scmp.lt.s32.totalorder %s3463_s22, %s3463_s22 }
  0x24   : > { %p3466_p13 = pnand %p3464_p1, %p3428_p12 }
  0x25   : > { %p3473_p5 = por %p3472_p6, %p3471_p2 }
  0x26   : > { %p3467_p0 = pneg %p3466_p13 }
  0x27   : > { %3249 = dma.hbm_to_vmem [thread:$0]  (!%p3707_p11), %s4206_s1, 1024, %s221_s11, [#allocation7], %s3609_s18, %s3609_s18, %s3610_s19  }
  0x28   : > { %p3474_p3 = pnand %p3473_p5, %p3467_p0 }
  0x2a   : > { %3477 = shalt.err (!%p3474_p3)
}
  0x2b   : > { %3252 = dma.hbm_to_vmem [thread:$0]  (!%p3707_p11), %s4191_s2, 9216, %s234_s14, [#allocation7], %s3609_s18, %s3609_s18, %s3610_s19  }
  0x2c   : > { %s3489_s10 = scalar_lea.vmem %s247_s16, 1024  ;;  %p3497_p9 = scmp.lt.s32.totalorder %s247_s16, %s247_s16 }
  0x2d   : > { %p3490_p10 = scmp.ne.s32.totalorder %s247_s16, %s3489_s10  ;;  %p3498_p13 = scmp.lt.s32.totalorder %s3489_s10, %s3489_s10 }
  0x2f   : > { %p3492_p7 = pnand %p3490_p10, %p3428_p12  ;;  %p3499_p4 = por %p3498_p13, %p3497_p9 }
  0x31   : > { %p3493_p1 = pneg %p3492_p7 }
  0x33   : > { %p3500_p2 = pnand %p3499_p4, %p3493_p1 }
  0x35   : > { %3503 = shalt.err (!%p3500_p2)
}
  0x36   : > { %3255 = dma.hbm_to_vmem [thread:$0]  (!%p3707_p11), %s4192_s3, 1024, %s247_s16, [#allocation10], %s3609_s18, %s3609_s18, %s3610_s19  }
  0x37   : > { %s3738_s14 = sadd.s32 1, %s3604_s27   ;;  %s32_s12 = sadd.s32 1, %s3600_s26 }
  0x38   : > { %s29_s15 = ssub.s32 %s3604_s27, %s3738_s14  ;;  %p39_p6 = scmp.ne.s32.totalorder %s3600_s26, %s3596_s25 }
  0x39   : > { %p30_p4 = scmp.eq.s32.totalorder %s29_s15, 0  ;;  %p40_p12 = scmp.eq.s32.totalorder %s3604_s27, 0 }
  0x3a   : > { %p3267_p0 = scmp.lt.s32.totalorder %s3604_s27, 2  ;;  %p4207_p3 = scmp.eq.s32.totalorder %s3679_s28, 1 }
  0x3b   : > { %s3748_s17 = scalar_select %p30_p4, %s3600_s26, %s32_s12  }
  0x3c   : > { %p41_p5 = por %p40_p12, %p39_p6  ;;  %p3752_p10 = por %p4207_p3, %p39_p6 }
  0x3d   : > { %s269_s21 = sand.u32 1, %s3600_s26   ;;  %s2708_s22 = sshll.u32 %s3604_s27, 10 }
  0x3e   : > { %s4208_s20 = scalar_select %p3752_p10, 1, 0 }
  0x3f   : > { %s2579_s16 = sshll.u32 %s269_s21, 6  ;;  %s3761_s23 = scalar_lea.hbm %s4189_s0, %s2708_s22 }
  0x40   : > { %s273_s29 = scalar_lea.vmem [#allocation3], %s2579_s16  ;;  %p3763_p11 = pnand %p3267_p0, %p41_p5 }
  0x41   : > { %s280_s10 = sshll.u32 %s273_s29, 4  ;;  %s3769_s13 = scalar_lea.sflag [#allocation4], %s269_s21  ;;  %s3767_s10 = int_to_ptr.vmem [resolvable:$true] %s280_s10 }
  0x42   : > { %s3504_s15 = scalar_lea.hbm %s3761_s23, 1024  ;;  %p3506_p1 = pneg %p3763_p11 }
  0x43   : > { %p3505_p7 = scmp.ne.s32.totalorder %s3761_s23, %s3504_s15  ;;  %s3509_s16 = scalar_lea.hbm %s4189_s0, 2048 }
  0x44   : > { %p3510_p2 = scmp.lt.s32.totalorder %s3761_s23, %s4189_s0  ;;  %p3511_p4 = scmp.lt.s32.totalorder %s3509_s16, %s3504_s15 }
  0x45   : > { %p3507_p9 = pnand %p3506_p1, %p3505_p7 }
  0x46   : > { %p3512_p6 = por %p3511_p4, %p3510_p2 }
  0x47   : > { %p3508_p13 = pneg %p3507_p9 }
  0x49   : > { %p3513_p12 = pnand %p3512_p6, %p3508_p13 }
  0x4b   : > { %3516 = shalt.err (!%p3513_p12)
}
  0x4c   : > { %s3517_s21 = scalar_lea.vmem %s3767_s10, 1024  ;;  %s3611_s29 = smov [#allocation3]  }
  0x4d   : > { %p3518_p0 = scmp.ne.s32.totalorder %s3767_s10, %s3517_s21  ;;  %s3522_s1 = sshll.u32 %s3611_s29, 4  ;;  %s3523_s1 = int_to_ptr.vmem [resolvable:$false] %s3522_s1 }
  0x4e   : > { %s3524_s12 = scalar_lea.vmem %s3523_s1, 2048  ;;  %p3525_p7 = scmp.lt.s32.totalorder %s3767_s10, %s3523_s1 }
  0x4f   : > { %p3520_p5 = pnand %p3518_p0, %p3506_p1  ;;  %p3526_p9 = scmp.lt.s32.totalorder %s3524_s12, %s3517_s21 }
  0x51   : > { %p3521_p3 = pneg %p3520_p5  ;;  %p3527_p10 = por %p3526_p9, %p3525_p7 }
  0x53   : > { %p3528_p8 = pnand %p3527_p10, %p3521_p3 }
  0x55   : > { %3531 = shalt.err (!%p3528_p8)
}
  0x56   : > { %s3612_s15 = smov 128   ;;  %s3613_s22 = smov 8  }
  0x57   : > { %3259 = dma.hbm_to_vmem [thread:$0]  (!%p3763_p11), %s3761_s23, 1024, %s3767_s10, %s3769_s13, %s3612_s15, %s3612_s15, %s3613_s22  }
  0x58   : > { %p4210_p1 = scmp.ne.s32.totalorder %s4204_s9, 0 }
  0x59   : > { %s3793_s16 = sand.u32 (!%p4210_p1), 1, %s3596_s25   ;;  %p4211_p8 = scmp.ne.s32.totalorder (!%p4210_p1), %s4202_s30, 0 }
  0x5a   : > { %292 = sbr.rel (%p4210_p1) target bundleno = 931 (0x3a3), region = 48  ;;  %s2583_s1 = sshll.u32 (!%p4210_p1), %s3793_s16, 6 }
  0x5b   : > { %s295_s18 = scalar_lea.sflag (!%p4210_p1), [#allocation4], %s3793_s16  ;;  %s3799_s19 = scalar_lea.vmem (!%p4210_p1), [#allocation3], %s2583_s1 }
  0x5f   : > { %3575 = dma.done.wait (%p4211_p8), %s295_s18, 1024  }
  0x60   : > { %3577 = vsyncadd (%p4211_p8), %s295_s18, 4294966272  ;;  %p4212_p10 = scmp.eq.s32.totalorder %s3679_s28, 0 }
  0x62   : > { %3579 = dma.done.wait (%p4212_p10), [#allocation7], 10240   ;;  %p4213_p11 = pmov %p4212_p10 }
  0x63   : > { %p4214_p13 = pmov %p4212_p10 }
  0x64   : > { %3581 = vsyncadd (%p4213_p11), [#allocation7], 4294957056 }
  0x65   : > { %3583 = dma.done.wait (%p4214_p13), [#allocation10], 1024   ;;  %p4215_p2 = pmov %p4212_p10 }
  0x66   : > { %v3314_v0 = vld [vmem:[#allocation6 + $0x38] sm:$0xff]   ;;  %v3315_v1 = vld [vmem:[#allocation6 + $0x30] sm:$0xff]   ;;  %v3316_v2 = vld [vmem:[#allocation6 + $0x28] sm:$0xff]   ;;  %v3614_v31 = vmov 0   ;;  %s4125_s21 = scalar_lea.vmem [#allocation11], %s2583_s1  ;;  %s2709_s12 = sshll.u32 %s3679_s28, 10 }
  0x67   : > { %3585 = vsyncadd (%p4215_p2), [#allocation10], 4294966272  ;;  %2878 = vmatprep.subr.bf16.mxu0 %v3314_v0  ;;  %v3317_v3 = vld [vmem:[#allocation6 + $0x20] sm:$0xff]   ;;  %v343_v5 = vld [vmem:[%s3799_s19 + $0x8] sm:$0xff]  ;;  %498 = vst [vmem:[#allocation2] sm:$0xf] %v3614_v31  ;;  %s4144_s1 = scalar_lea.hbm %s4196_s7, %s2709_s12 }
  0x68   : > { %2879 = vmatpush3.bf16.msra.mxu0 %v3314_v0  ;;  %v342_v4 = vld [vmem:[%s3799_s19] sm:$0xff]  ;;  %v3318_v7 = vld [vmem:[#allocation6 + $0x18] sm:$0xff]   ;;  %v3325_v9 = vld [vmem:[#allocation8 + $0xf0] sm:$0xff]   ;;  %499 = vst [vmem:[#allocation2 + $0x4] sm:$0xf] %v3614_v31  ;;  %s2471_s29 = sshll.u32 %s4125_s21, 4  ;;  %s4138_s29 = int_to_ptr.vmem [resolvable:$true] %s2471_s29 }
  0x69   : > { %2880 = vmatprep.subr.bf16.mxu0 %v3315_v1  ;;  %v350_v6 = vpack.c.bf16 %v343_v5, %v342_v4  ;;  %v3323_v8 = vld [vmem:[#allocation8 + $0xf8] sm:$0xff]   ;;  %v3319_v10 = vld [vmem:[#allocation6 + $0x10] sm:$0xff]   ;;  %v3327_v11 = vld [vmem:[#allocation8 + $0xe8] sm:$0xff]   ;;  %501 = vst [vmem:[#allocation2 + $0x48] sm:$0xf] %v3614_v31  ;;  %s2458_s18 = scalar_lea.sflag [#allocation5], %s3793_s16 }
  0x6a   : > { %2902 = vmatprep.subr.bf16.mxu1 %v3323_v8  ;;  %v3320_v12 = vld [vmem:[#allocation6 + $0x8] sm:$0xff]   ;;  %v3321_v13 = vld [vmem:[#allocation6] sm:$0xff]   ;;  %v344_v14 = vld [vmem:[%s3799_s19 + $0x10] sm:$0xff]  ;;  %502 = vst [vmem:[#allocation2 + $0x4c] sm:$0xf] %v3614_v31  ;;  %p4216_p6 = scmp.ne.s32.totalorder %s4208_s20, 0 }
  0x6b   : > { %2894 = vmatprep.mubr.bf16.mxu0 %v350_v6  ;;  %2903 = vmatpush3.bf16.msra.mxu1 %v3323_v8  ;;  %v345_v15 = vld [vmem:[%s3799_s19 + $0x18] sm:$0xff]  ;;  %v346_v16 = vld [vmem:[%s3799_s19 + $0x20] sm:$0xff]  ;;  %v347_v17 = vld [vmem:[%s3799_s19 + $0x28] sm:$0xff]  ;;  %504 = vst [vmem:[#allocation2 + $0xc] sm:$0xf] %v3614_v31  ;;  %s3615_s28 = smov [#allocation11]  }
  0x6c   : > { %2881 = vmatpush3.bf16.msra.mxu0 %v3315_v1  ;;  %2904 = vmatprep.subr.bf16.mxu1 %v3325_v9  ;;  %v3322_v18 = vld [vmem:[#allocation8 + $0x38] sm:$0xff]   ;;  %v351_v19 = vpack.c.bf16 %v345_v15, %v344_v14  ;;  %v3324_v20 = vld [vmem:[#allocation8 + $0x30] sm:$0xff]   ;;  %v352_v21 = vpack.c.bf16 %v347_v17, %v346_v16  ;;  %v3326_v24 = vld [vmem:[#allocation8 + $0x28] sm:$0xff]   ;;  %505 = vst [vmem:[#allocation2 + $0x14] sm:$0xf] %v3614_v31  ;;  %s3536_s30 = sshll.u32 %s3615_s28, 4  ;;  %s3537_s30 = int_to_ptr.vmem [resolvable:$false] %s3536_s30 }
  0x6d   : > { %2882 = vmatprep.subr.bf16.mxu0 %v3316_v2  ;;  %v348_v22 = vld [vmem:[%s3799_s19 + $0x30] sm:$0xff]  ;;  %v349_v23 = vld [vmem:[%s3799_s19 + $0x38] sm:$0xff]  ;;  %v3328_v26 = vld [vmem:[#allocation8 + $0x20] sm:$0xff]   ;;  %506 = vst [vmem:[#allocation2 + $0x1c] sm:$0xf] %v3614_v31  ;;  %s3538_s9 = scalar_lea.vmem %s3537_s30, 2048  ;;  %p3539_p5 = scmp.lt.s32.totalorder %s4138_s29, %s3537_s30 }
  0x6e   : > { %v353_v25 = vpack.c.bf16 %v349_v23, %v348_v22  ;;  %v3329_v27 = vld [vmem:[#allocation8 + $0xe0] sm:$0xff]   ;;  %v3330_v28 = vld [vmem:[#allocation8 + $0x18] sm:$0xff]   ;;  %v3332_v30 = vld [vmem:[#allocation8 + $0x10] sm:$0xff]   ;;  %507 = vst [vmem:[#allocation2 + $0x24] sm:$0xf] %v3614_v31 }
  0x6f   : > { %2905 = vmatpush3.bf16.msra.mxu1 %v3325_v9  ;;  %v3331_v29 = vld [vmem:[#allocation8 + $0xd8] sm:$0xff]   ;;  %508 = vst [vmem:[#allocation2 + $0x2c] sm:$0xf] %v3614_v31  ;;  %509 = vst [vmem:[#allocation2 + $0x34] sm:$0xf] %v3614_v31  ;;  %v3333_v32 = vld [vmem:[#allocation8 + $0xd0] sm:$0xff]  }
  0x70   : > { %2883 = vmatpush3.bf16.msra.mxu0 %v3316_v2  ;;  %2906 = vmatprep.subr.bf16.mxu1 %v3327_v11  ;;  %510 = vst [vmem:[#allocation2 + $0x3c] sm:$0xf] %v3614_v31  ;;  %511 = vst [vmem:[#allocation2 + $0x44] sm:$0xf] %v3614_v31  ;;  %v3334_v33 = vld [vmem:[#allocation8 + $0x8] sm:$0xff]   ;;  %v3336_v35 = vld [vmem:[#allocation8] sm:$0xff]  }
  0x71   : > { %2884 = vmatprep.subr.bf16.mxu0 %v3317_v3  ;;  %v3335_v34 = vld [vmem:[#allocation8 + $0xc8] sm:$0xff]   ;;  %v3821_v36 = vld [vmem:[#allocation2] sm:$0xff]   ;;  %v3337_v37 = vld [vmem:[#allocation8 + $0xc0] sm:$0xff]  }
  0x72   : > { %v3341_v38 = vld [vmem:[#allocation8 + $0x138] sm:$0xff]   ;;  %v2588_v40 = vld [vmem:[%s4193_s4] ss:$0 sm:$0xff]  ;;  %v3349_v15 = vld [vmem:[#allocation8 + $0x128] sm:$0xff]  }
  0x73   : > { %2907 = vmatpush3.bf16.msra.mxu1 %v3327_v11  ;;  %v3342_v39 = vld [vmem:[#allocation8 + $0x1b8] sm:$0xff]   ;;  %v3351_v17 = vld [vmem:[#allocation8 + $0x1a8] sm:$0xff]   ;;  %v3355_v22 = vld [vmem:[#allocation8 + $0x1a0] sm:$0xff]  }
  0x74   : > { %2885 = vmatpush3.bf16.msra.mxu0 %v3317_v3  ;;  %2908 = vmatprep.subr.bf16.mxu1 %v3329_v27 }
  0x75   : > { %2886 = vmatprep.subr.bf16.mxu0 %v3318_v7 }
  0x77   : > { %2909 = vmatpush3.bf16.msra.mxu1 %v3329_v27  ;;  %v3361_v27 = vld [vmem:[#allocation8 + $0x110] sm:$0xff]  }
  0x78   : > { %2887 = vmatpush3.bf16.msra.mxu0 %v3318_v7  ;;  %2910 = vmatprep.subr.bf16.mxu1 %v3331_v29 }
  0x79   : > { %2888 = vmatprep.subr.bf16.mxu0 %v3319_v10 }
  0x7b   : > { %2911 = vmatpush3.bf16.msra.mxu1 %v3331_v29 }
  0x7c   : > { %2889 = vmatpush3.bf16.msra.mxu0 %v3319_v10  ;;  %2912 = vmatprep.subr.bf16.mxu1 %v3333_v32  ;;  %v3345_v10 = vld [vmem:[#allocation8 + $0x130] sm:$0xff]  }
  0x7d   : > { %2890 = vmatprep.subr.bf16.mxu0 %v3320_v12 }
  0x7f   : > { %2913 = vmatpush3.bf16.msra.mxu1 %v3333_v32  ;;  %v3365_v32 = vld [vmem:[#allocation8 + $0x108] sm:$0xff]  }
  0x80   : > { %2891 = vmatpush3.bf16.msra.mxu0 %v3320_v12  ;;  %2914 = vmatprep.subr.bf16.mxu1 %v3335_v34  ;;  %v3347_v12 = vld [vmem:[#allocation8 + $0x1b0] sm:$0xff]  }
  0x81   : > { %2892 = vmatprep.subr.bf16.mxu0 %v3321_v13 }
  0x83   : > { %2915 = vmatpush3.bf16.msra.mxu1 %v3335_v34  ;;  %v3366_v34 = vld [vmem:[#allocation8 + $0x188] sm:$0xff]  }
  0x84   : > { %2893 = vmatpush3.bf16.msra.mxu0 %v3321_v13  ;;  %2916 = vmatprep.subr.bf16.mxu1 %v3337_v37 }
  0x85   : > { %2934 = vmatprep.subr.bf16.mxu0 %v3322_v18 }
  0x87   : > { %2895 = vmatmul.mubr.bf16.vlgmr.msra.gmra.mxu0 %v351_v19  ;;  %2917 = vmatpush3.bf16.msra.mxu1 %v3337_v37  ;;  %v3353_v19 = vld [vmem:[#allocation8 + $0x120] sm:$0xff]  }
  0x88   : > { %2898 = vmatprep.mubr.bf16.mxu0 %v352_v21  ;;  %2935 = vmatpush3.bf16.msra.mxu0 %v3322_v18 }
  0x89   : > { %2936 = vmatprep.subr.bf16.mxu0 %v3324_v20  ;;  %2966 = vmatprep.subr.bf16.mxu1 %v3342_v39 }
  0x8c   : > { %2937 = vmatpush3.bf16.msra.mxu0 %v3324_v20 }
  0x8d   : > { %2938 = vmatprep.subr.bf16.mxu0 %v3326_v24 }
  0x8f   : > { %2899 = vmatmul.mubr.bf16.gmra.mxu0 %v353_v25 }
  0x90   : > { %2939 = vmatpush3.bf16.msra.mxu0 %v3326_v24  ;;  %2950 = vmatprep.mubr.bf16.mxu0 %v3821_v36  ;;  %v3357_v24 = vld [vmem:[#allocation8 + $0x118] sm:$0xff]  }
  0x91   : > { %2940 = vmatprep.subr.bf16.mxu0 %v3328_v26 }
  0x94   : > { %2941 = vmatpush3.bf16.msra.mxu0 %v3328_v26  ;;  %v3359_v26 = vld [vmem:[#allocation8 + $0x198] sm:$0xff]  }
  0x95   : > { %2942 = vmatprep.subr.bf16.mxu0 %v3330_v28 }
  0x98   : > { %2943 = vmatpush3.bf16.msra.mxu0 %v3330_v28 }
  0x99   : > { %2944 = vmatprep.subr.bf16.mxu0 %v3332_v30 }
  0x9c   : > { %2945 = vmatpush3.bf16.msra.mxu0 %v3332_v30  ;;  %v3363_v30 = vld [vmem:[#allocation8 + $0x190] sm:$0xff]  }
  0x9d   : > { %2946 = vmatprep.subr.bf16.mxu0 %v3334_v33 }
  0xa0   : > { %2947 = vmatpush3.bf16.msra.mxu0 %v3334_v33 }
  0xa1   : > { %2948 = vmatprep.subr.bf16.mxu0 %v3336_v35 }
  0xa4   : > { %2949 = vmatpush3.bf16.msra.mxu0 %v3336_v35  ;;  %v3368_v35 = vld [vmem:[#allocation8 + $0x100] sm:$0xff]  }
  0xa5   : > { %2998 = vmatprep.subr.bf16.mxu0 %v3341_v38 }
 0x147   : > { %v2896_v41 = vpop.f32.mrf.mxu0 }
 0x148   : > { %v468_v42 = vadd.f32 %v2896_v41, %v2588_v40  ;;  %v3372_v41 = vld [vmem:[#allocation8 + $0x78] sm:$0xff]  }
 0x149   : > { %v459_v43 = vpop.f32.mrf.mxu0 }
 0x14a   : > { %v492_v44 = vmax.f32 %v468_v42, 0.0  ;;  %v460_v45 = vadd.f32 %v2588_v40, %v459_v43  ;;  %v3374_v42 = vld [vmem:[#allocation8 + $0x1f0] sm:$0xff]  }
 0x14b   : > { %v2897_v46 = vpop.f32.mrf.mxu0 }
 0x14c   : > { %v514_v47 = vpack.c.bf16 %v492_v44, %v492_v44  ;;  %v490_v48 = vmax.f32 %v460_v45, 0.0  ;;  %v471_v49 = vadd.f32 %v2897_v46, %v2588_v40  ;;  %v3376_v44 = vld [vmem:[#allocation8 + $0x70] sm:$0xff]   ;;  %v3377_v46 = vld [vmem:[#allocation8 + $0x1e8] sm:$0xff]  }
 0x14d   : > { %v462_v50 = vpop.f32.mrf.mxu0 }
 0x14e   : > { %522 = vst [vmem:[#allocation2 + $0x18] sm:$0xf] %v514_v47  ;;  %v512_v51 = vpack.c.bf16 %v490_v48, %v490_v48  ;;  %v493_v52 = vmax.f32 %v471_v49, 0.0  ;;  %v463_v53 = vadd.f32 %v2588_v40, %v462_v50  ;;  %v3378_v47 = vld [vmem:[#allocation8 + $0x68] sm:$0xff]   ;;  %v3380_v48 = vld [vmem:[#allocation8 + $0x1e0] sm:$0xff]  }
 0x14f   : > { %v2900_v54 = vpop.f32.mrf.mxu0  ;;  %v3382_v50 = vld [vmem:[#allocation8 + $0x60] sm:$0xff]  }
 0x150   : > { %520 = vst [vmem:[#allocation2 + $0x8] sm:$0xf] %v512_v51  ;;  %v515_v55 = vpack.c.bf16 %v493_v52, %v493_v52  ;;  %v491_v56 = vmax.f32 %v463_v53, 0.0  ;;  %v484_v57 = vadd.f32 %v2900_v54, %v2588_v40  ;;  %v3383_v52 = vld [vmem:[#allocation8 + $0x1d8] sm:$0xff]   ;;  %v3386_v54 = vld [vmem:[#allocation8 + $0x1d0] sm:$0xff]  }
 0x151   : > { %v475_v58 = vpop.f32.mrf.mxu0  ;;  %v3384_v53 = vld [vmem:[#allocation8 + $0x58] sm:$0xff]  }
 0x152   : > { %523 = vst [vmem:[#allocation2 + $0x20] sm:$0xf] %v515_v55  ;;  %v513_v59 = vpack.c.bf16 %v491_v56, %v491_v56  ;;  %v496_v60 = vmax.f32 %v484_v57, 0.0  ;;  %v476_v61 = vadd.f32 %v2588_v40, %v475_v58  ;;  %v3388_v56 = vld [vmem:[#allocation8 + $0x50] sm:$0xff]   ;;  %v3389_v58 = vld [vmem:[#allocation8 + $0x1c8] sm:$0xff]  }
 0x153   : > { %v2901_v62 = vpop.f32.mrf.mxu0 }
 0x154   : > { %521 = vst [vmem:[#allocation2 + $0x10] sm:$0xf] %v513_v59  ;;  %v518_v63 = vpack.c.bf16 %v496_v60, %v496_v60  ;;  %v494_v0 = vmax.f32 %v476_v61, 0.0  ;;  %v487_v1 = vadd.f32 %v2901_v62, %v2588_v40  ;;  %v3390_v59 = vld [vmem:[#allocation8 + $0x48] sm:$0xff]   ;;  %v3392_v60 = vld [vmem:[#allocation8 + $0x1c0] sm:$0xff]   ;;  %v3900_v61 = vld [vmem:[#allocation2 + $0x48] sm:$0xff]  }
 0x155   : > { %v478_v2 = vpop.f32.mrf.mxu0  ;;  %v3838_v16 = vld [vmem:[#allocation2 + $0x18] sm:$0xff]   ;;  %v3393_v62 = vld [vmem:[#allocation8 + $0x40] sm:$0xff]  }
 0x156   : > { %526 = vst [vmem:[#allocation2 + $0x38] sm:$0xf] %v518_v63  ;;  %v516_v3 = vpack.c.bf16 %v494_v0, %v494_v0  ;;  %v497_v4 = vmax.f32 %v487_v1, 0.0  ;;  %v479_v5 = vadd.f32 %v2588_v40, %v478_v2  ;;  %v3842_v18 = vld [vmem:[#allocation2 + $0x18] sm:$0xff]   ;;  %v3371_v40 = vld [vmem:[#allocation8 + $0x1f8] sm:$0xff]   ;;  %v3396_v1 = vld [vmem:[#allocation8 + $0xb0] sm:$0xff]  }
 0x157   : > { %v3827_v6 = vld [vmem:[#allocation2 + $0x8] sm:$0xff]   ;;  %v3878_v43 = vld [vmem:[#allocation2 + $0x18] sm:$0xff]   ;;  %v3397_v2 = vld [vmem:[#allocation8 + $0x170] sm:$0xff]  }
 0x158   : > { %524 = vst [vmem:[#allocation2 + $0x28] sm:$0xf] %v516_v3  ;;  %v519_v7 = vpack.c.bf16 %v497_v4, %v497_v4  ;;  %v495_v8 = vmax.f32 %v479_v5, 0.0  ;;  %v3829_v9 = vld [vmem:[#allocation2 + $0x8] sm:$0xff]   ;;  %2918 = vmatprep.mubr.bf16.mxu1 %v3827_v6  ;;  %v3398_v3 = vld [vmem:[#allocation8 + $0xa8] sm:$0xff]   ;;  %v3400_v5 = vld [vmem:[#allocation8 + $0xa0] sm:$0xff]  }
 0x159   : > { %2951 = vmatmul.mubr.bf16.vlgmr.msra.gmra.mxu0 %v3829_v9  ;;  %v3844_v20 = vld [vmem:[#allocation2 + $0x20] sm:$0xff]   ;;  %v3394_v63 = vld [vmem:[#allocation8 + $0xb8] sm:$0xff]   ;;  %v3399_v4 = vld [vmem:[#allocation8 + $0x168] sm:$0xff]  }
 0x15a   : > { %527 = vst [vmem:[#allocation2 + $0x40] sm:$0xf] %v519_v7  ;;  %v517_v11 = vpack.c.bf16 %v495_v8, %v495_v8  ;;  %2999 = vmatpush3.bf16.msra.mxu0 %v3341_v38  ;;  %v3850_v23 = vld [vmem:[#allocation2 + $0x20] sm:$0xff]   ;;  %v3370_v38 = vld [vmem:[#allocation8 + $0x180] sm:$0xff]   ;;  %v3395_v0 = vld [vmem:[#allocation8 + $0x178] sm:$0xff]  }
 0x15b   : > { %v3833_v13 = vld [vmem:[#allocation2 + $0x10] sm:$0xff]   ;;  %3000 = vmatprep.subr.bf16.mxu0 %v3345_v10  ;;  %v3880_v45 = vld [vmem:[#allocation2 + $0x20] sm:$0xff]   ;;  %v3402_v8 = vld [vmem:[#allocation8 + $0x98] sm:$0xff]  }
 0x15c   : > { %525 = vst [vmem:[#allocation2 + $0x30] sm:$0xf] %v517_v11  ;;  %v3835_v14 = vld [vmem:[#allocation2 + $0x10] sm:$0xff]   ;;  %2919 = vmatmul.mubr.bf16.vlgmr.msra.gmra.mxu1 %v3833_v13  ;;  %v3404_v11 = vld [vmem:[#allocation8 + $0x90] sm:$0xff]  }
 0x15d   : > { %2954 = vmatprep.mubr.bf16.mxu0 %v3835_v14  ;;  %2967 = vmatpush3.bf16.msra.mxu1 %v3342_v39  ;;  %v3862_v31 = vld [vmem:[#allocation2 + $0x38] sm:$0xff]   ;;  %v3872_v39 = vld [vmem:[#allocation2 + $0x10] sm:$0xff]  }
 0x15e   : > { %2922 = vmatprep.mubr.bf16.mxu1 %v3838_v16  ;;  %3001 = vmatpush3.bf16.msra.mxu0 %v3345_v10  ;;  %v3866_v33 = vld [vmem:[#allocation2 + $0x38] sm:$0xff]   ;;  %v3401_v7 = vld [vmem:[#allocation8 + $0x160] sm:$0xff]   ;;  %v3403_v10 = vld [vmem:[#allocation8 + $0x158] sm:$0xff]  }
 0x15f   : > { %2968 = vmatprep.subr.bf16.mxu1 %v3347_v12  ;;  %3002 = vmatprep.subr.bf16.mxu0 %v3349_v15  ;;  %v3847_v21 = vld [vmem:[#allocation2 + $0x28] sm:$0xff]   ;;  %v3894_v55 = vld [vmem:[#allocation2 + $0x38] sm:$0xff]  }
 0x160   : > { %v3854_v25 = vld [vmem:[#allocation2 + $0x28] sm:$0xff]  }
 0x161   : > { %2955 = vmatmul.mubr.bf16.gmra.mxu0 %v3842_v18  ;;  %2969 = vmatpush3.bf16.msra.mxu1 %v3347_v12  ;;  %v3870_v37 = vld [vmem:[#allocation2 + $0x40] sm:$0xff]   ;;  %v3886_v49 = vld [vmem:[#allocation2 + $0x28] sm:$0xff]  }
 0x162   : > { %2958 = vmatprep.mubr.bf16.mxu0 %v3844_v20  ;;  %3003 = vmatpush3.bf16.msra.mxu0 %v3349_v15  ;;  %v3896_v57 = vld [vmem:[#allocation2 + $0x40] sm:$0xff]   ;;  %v3406_v15 = vld [vmem:[#allocation8 + $0x88] sm:$0xff]  }
 0x163   : > { %2970 = vmatprep.subr.bf16.mxu1 %v3351_v17  ;;  %3004 = vmatprep.subr.bf16.mxu0 %v3353_v19  ;;  %v3856_v28 = vld [vmem:[#allocation2 + $0x30] sm:$0xff]   ;;  %v3405_v12 = vld [vmem:[#allocation8 + $0x150] sm:$0xff]  }
 0x164   : > { %2923 = vmatmul.mubr.bf16.gmra.mxu1 %v3850_v23  ;;  %v3860_v29 = vld [vmem:[#allocation2 + $0x30] sm:$0xff]  }
 0x165   : > { %2971 = vmatpush3.bf16.msra.mxu1 %v3351_v17  ;;  %2926 = vmatprep.mubr.bf16.mxu1 %v3847_v21  ;;  %v3888_v51 = vld [vmem:[#allocation2 + $0x30] sm:$0xff]   ;;  %v3407_v17 = vld [vmem:[#allocation8 + $0x148] sm:$0xff]  }
 0x166   : > { %3005 = vmatpush3.bf16.msra.mxu0 %v3353_v19  ;;  %2972 = vmatprep.subr.bf16.mxu1 %v3355_v22  ;;  %v3408_v19 = vld [vmem:[#allocation8 + $0x80] sm:$0xff]  }
 0x167   : > { %3006 = vmatprep.subr.bf16.mxu0 %v3357_v24 }
 0x169   : > { %2959 = vmatmul.mubr.bf16.gmra.mxu0 %v3854_v25  ;;  %2973 = vmatpush3.bf16.msra.mxu1 %v3355_v22  ;;  %v3409_v22 = vld [vmem:[#allocation8 + $0x140] sm:$0xff]  }
 0x16a   : > { %2962 = vmatprep.mubr.bf16.mxu0 %v3856_v28  ;;  %3007 = vmatpush3.bf16.msra.mxu0 %v3357_v24  ;;  %v3410_v24 = vld [vmem:[#allocation8 + $0x238] sm:$0xff]  }
 0x16b   : > { %2974 = vmatprep.subr.bf16.mxu1 %v3359_v26  ;;  %3008 = vmatprep.subr.bf16.mxu0 %v3361_v27 }
 0x16c   : > { %2927 = vmatmul.mubr.bf16.gmra.mxu1 %v3860_v29 }
 0x16d   : > { %2975 = vmatpush3.bf16.msra.mxu1 %v3359_v26  ;;  %2930 = vmatprep.mubr.bf16.mxu1 %v3862_v31  ;;  %v3411_v26 = vld [vmem:[#allocation8 + $0x230] sm:$0xff]  }
 0x16e   : > { %3009 = vmatpush3.bf16.msra.mxu0 %v3361_v27  ;;  %2976 = vmatprep.subr.bf16.mxu1 %v3363_v30 }
 0x16f   : > { %3010 = vmatprep.subr.bf16.mxu0 %v3365_v32 }
 0x171   : > { %2963 = vmatmul.mubr.bf16.gmra.mxu0 %v3866_v33  ;;  %2977 = vmatpush3.bf16.msra.mxu1 %v3363_v30 }
 0x172   : > { %3011 = vmatpush3.bf16.msra.mxu0 %v3365_v32  ;;  %3014 = vmatprep.mubr.bf16.mxu0 %v3827_v6  ;;  %v3420_v32 = vld [vmem:[#allocation9 + $0x28] sm:$0xff]  }
 0x173   : > { %2978 = vmatprep.subr.bf16.mxu1 %v3366_v34  ;;  %3012 = vmatprep.subr.bf16.mxu0 %v3368_v35 }
 0x174   : > { %2931 = vmatmul.mubr.bf16.gmra.mxu1 %v3870_v37 }
 0x175   : > { %2979 = vmatpush3.bf16.msra.mxu1 %v3366_v34  ;;  %2982 = vmatprep.mubr.bf16.mxu1 %v3872_v39 }
 0x176   : > { %3013 = vmatpush3.bf16.msra.mxu0 %v3368_v35  ;;  %2980 = vmatprep.subr.bf16.mxu1 %v3370_v38 }
 0x177   : > { %3062 = vmatprep.subr.bf16.mxu0 %v3371_v40 }
 0x179   : > { %2981 = vmatpush3.bf16.msra.mxu1 %v3370_v38  ;;  %3015 = vmatmul.mubr.bf16.vlgmr.msra.gmra.mxu0 %v3833_v13 }
 0x17a   : > { %3018 = vmatprep.mubr.bf16.mxu0 %v3838_v16  ;;  %3063 = vmatpush3.bf16.msra.mxu0 %v3371_v40  ;;  %v3421_v40 = vld [vmem:[#allocation9 + $0x20] sm:$0xff]  }
 0x17b   : > { %3030 = vmatprep.subr.bf16.mxu1 %v3372_v41  ;;  %3064 = vmatprep.subr.bf16.mxu0 %v3374_v42 }
 0x17c   : > { %2983 = vmatmul.mubr.bf16.vlgmr.msra.gmra.mxu1 %v3878_v43 }
 0x17d   : > { %3031 = vmatpush3.bf16.msra.mxu1 %v3372_v41  ;;  %2986 = vmatprep.mubr.bf16.mxu1 %v3880_v45 }
 0x17e   : > { %3065 = vmatpush3.bf16.msra.mxu0 %v3374_v42  ;;  %3032 = vmatprep.subr.bf16.mxu1 %v3376_v44 }
 0x17f   : > { %3066 = vmatprep.subr.bf16.mxu0 %v3377_v46 }
 0x181   : > { %3019 = vmatmul.mubr.bf16.gmra.mxu0 %v3850_v23  ;;  %3033 = vmatpush3.bf16.msra.mxu1 %v3376_v44 }
 0x182   : > { %3022 = vmatprep.mubr.bf16.mxu0 %v3847_v21  ;;  %3067 = vmatpush3.bf16.msra.mxu0 %v3377_v46 }
 0x183   : > { %3034 = vmatprep.subr.bf16.mxu1 %v3378_v47  ;;  %3068 = vmatprep.subr.bf16.mxu0 %v3380_v48 }
 0x184   : > { %2987 = vmatmul.mubr.bf16.gmra.mxu1 %v3886_v49 }
 0x185   : > { %3035 = vmatpush3.bf16.msra.mxu1 %v3378_v47  ;;  %2990 = vmatprep.mubr.bf16.mxu1 %v3888_v51  ;;  %v3422_v47 = vld [vmem:[#allocation9 + $0x18] sm:$0xff]  }
 0x186   : > { %3069 = vmatpush3.bf16.msra.mxu0 %v3380_v48  ;;  %3036 = vmatprep.subr.bf16.mxu1 %v3382_v50 }
 0x187   : > { %3070 = vmatprep.subr.bf16.mxu0 %v3383_v52 }
 0x189   : > { %3023 = vmatmul.mubr.bf16.gmra.mxu0 %v3860_v29  ;;  %3037 = vmatpush3.bf16.msra.mxu1 %v3382_v50 }
 0x18a   : > { %3026 = vmatprep.mubr.bf16.mxu0 %v3862_v31  ;;  %3071 = vmatpush3.bf16.msra.mxu0 %v3383_v52 }
 0x18b   : > { %3038 = vmatprep.subr.bf16.mxu1 %v3384_v53  ;;  %3072 = vmatprep.subr.bf16.mxu0 %v3386_v54 }
 0x18c   : > { %2991 = vmatmul.mubr.bf16.gmra.mxu1 %v3894_v55 }
 0x18d   : > { %3039 = vmatpush3.bf16.msra.mxu1 %v3384_v53  ;;  %2994 = vmatprep.mubr.bf16.mxu1 %v3896_v57 }
 0x18e   : > { %3073 = vmatpush3.bf16.msra.mxu0 %v3386_v54  ;;  %3040 = vmatprep.subr.bf16.mxu1 %v3388_v56  ;;  %v3423_v54 = vld [vmem:[#allocation9 + $0x10] sm:$0xff]  }
 0x18f   : > { %3074 = vmatprep.subr.bf16.mxu0 %v3389_v58 }
 0x191   : > { %3027 = vmatmul.mubr.bf16.gmra.mxu0 %v3870_v37  ;;  %3041 = vmatpush3.bf16.msra.mxu1 %v3388_v56 }
 0x192   : > { %3075 = vmatpush3.bf16.msra.mxu0 %v3389_v58  ;;  %3078 = vmatprep.mubr.bf16.mxu0 %v3872_v39 }
 0x193   : > { %3042 = vmatprep.subr.bf16.mxu1 %v3390_v59  ;;  %3076 = vmatprep.subr.bf16.mxu0 %v3392_v60 }
 0x194   : > { %2995 = vmatmul.mubr.bf16.gmra.mxu1 %v3900_v61 }
 0x195   : > { %3043 = vmatpush3.bf16.msra.mxu1 %v3390_v59  ;;  %3046 = vmatprep.mubr.bf16.mxu1 %v3821_v36 }
 0x196   : > { %3077 = vmatpush3.bf16.msra.mxu0 %v3392_v60  ;;  %3044 = vmatprep.subr.bf16.mxu1 %v3393_v62 }
 0x197   : > { %3126 = vmatprep.subr.bf16.mxu0 %v3394_v63 }
 0x199   : > { %3045 = vmatpush3.bf16.msra.mxu1 %v3393_v62  ;;  %3079 = vmatmul.mubr.bf16.vlgmr.msra.gmra.mxu0 %v3878_v43 }
 0x19a   : > { %3082 = vmatprep.mubr.bf16.mxu0 %v3880_v45  ;;  %3127 = vmatpush3.bf16.msra.mxu0 %v3394_v63 }
 0x19b   : > { %3094 = vmatprep.subr.bf16.mxu1 %v3395_v0  ;;  %3128 = vmatprep.subr.bf16.mxu0 %v3396_v1 }
 0x19c   : > { %3047 = vmatmul.mubr.bf16.vlgmr.msra.gmra.mxu1 %v3829_v9 }
 0x19d   : > { %3095 = vmatpush3.bf16.msra.mxu1 %v3395_v0  ;;  %3050 = vmatprep.mubr.bf16.mxu1 %v3835_v14 }
 0x19e   : > { %3129 = vmatpush3.bf16.msra.mxu0 %v3396_v1  ;;  %3096 = vmatprep.subr.bf16.mxu1 %v3397_v2 }
 0x19f   : > { %3130 = vmatprep.subr.bf16.mxu0 %v3398_v3 }
 0x1a1   : > { %3083 = vmatmul.mubr.bf16.gmra.mxu0 %v3886_v49  ;;  %3097 = vmatpush3.bf16.msra.mxu1 %v3397_v2 }
 0x1a2   : > { %3086 = vmatprep.mubr.bf16.mxu0 %v3888_v51  ;;  %3131 = vmatpush3.bf16.msra.mxu0 %v3398_v3 }
 0x1a3   : > { %3098 = vmatprep.subr.bf16.mxu1 %v3399_v4  ;;  %3132 = vmatprep.subr.bf16.mxu0 %v3400_v5 }
 0x1a4   : > { %3051 = vmatmul.mubr.bf16.gmra.mxu1 %v3842_v18 }
 0x1a5   : > { %3099 = vmatpush3.bf16.msra.mxu1 %v3399_v4  ;;  %3054 = vmatprep.mubr.bf16.mxu1 %v3844_v20  ;;  %v3425_v4 = vld [vmem:[#allocation9] sm:$0xff]  }
 0x1a6   : > { %3133 = vmatpush3.bf16.msra.mxu0 %v3400_v5  ;;  %3100 = vmatprep.subr.bf16.mxu1 %v3401_v7 }
 0x1a7   : > { %3134 = vmatprep.subr.bf16.mxu0 %v3402_v8 }
 0x1a9   : > { %3087 = vmatmul.mubr.bf16.gmra.mxu0 %v3894_v55  ;;  %3101 = vmatpush3.bf16.msra.mxu1 %v3401_v7 }
 0x1aa   : > { %3090 = vmatprep.mubr.bf16.mxu0 %v3896_v57  ;;  %3135 = vmatpush3.bf16.msra.mxu0 %v3402_v8 }
 0x1ab   : > { %3102 = vmatprep.subr.bf16.mxu1 %v3403_v10  ;;  %3136 = vmatprep.subr.bf16.mxu0 %v3404_v11 }
 0x1ac   : > { %3055 = vmatmul.mubr.bf16.gmra.mxu1 %v3854_v25 }
 0x1ad   : > { %3103 = vmatpush3.bf16.msra.mxu1 %v3403_v10  ;;  %3058 = vmatprep.mubr.bf16.mxu1 %v3856_v28 }
 0x1ae   : > { %3137 = vmatpush3.bf16.msra.mxu0 %v3404_v11  ;;  %3104 = vmatprep.subr.bf16.mxu1 %v3405_v12 }
 0x1af   : > { %3138 = vmatprep.subr.bf16.mxu0 %v3406_v15 }
 0x1b1   : > { %3091 = vmatmul.mubr.bf16.gmra.mxu0 %v3900_v61  ;;  %3105 = vmatpush3.bf16.msra.mxu1 %v3405_v12 }
 0x1b2   : > { %3139 = vmatpush3.bf16.msra.mxu0 %v3406_v15  ;;  %3106 = vmatprep.subr.bf16.mxu1 %v3407_v17 }
 0x1b3   : > { %3140 = vmatprep.subr.bf16.mxu0 %v3408_v19  ;;  %3142 = vmatprep.mubr.bf16.mxu0 %v3821_v36  ;;  %v3412_v36 = vld [vmem:[#allocation8 + $0x228] sm:$0xff]  }
 0x1b4   : > { %3059 = vmatmul.mubr.bf16.gmra.mxu1 %v3866_v33 }
 0x1b5   : > { %3107 = vmatpush3.bf16.msra.mxu1 %v3407_v17  ;;  %3110 = vmatprep.mubr.bf16.mxu1 %v3827_v6  ;;  %v3413_v6 = vld [vmem:[#allocation8 + $0x220] sm:$0xff]  }
 0x1b6   : > { %3141 = vmatpush3.bf16.msra.mxu0 %v3408_v19  ;;  %3108 = vmatprep.subr.bf16.mxu1 %v3409_v22 }
 0x1b9   : > { %3109 = vmatpush3.bf16.msra.mxu1 %v3409_v22  ;;  %3143 = vmatmul.mubr.bf16.vlgmr.msra.gmra.mxu0 %v3829_v9  ;;  %v3414_v9 = vld [vmem:[#allocation8 + $0x218] sm:$0xff]  }
 0x1ba   : > { %3146 = vmatprep.mubr.bf16.mxu0 %v3835_v14  ;;  %3158 = vmatprep.subr.bf16.mxu1 %v3410_v24  ;;  %v3416_v14 = vld [vmem:[#allocation8 + $0x208] sm:$0xff]  }
 0x1bc   : > { %3111 = vmatmul.mubr.bf16.vlgmr.msra.gmra.mxu1 %v3833_v13  ;;  %v3415_v13 = vld [vmem:[#allocation8 + $0x210] sm:$0xff]  }
 0x1bd   : > { %3159 = vmatpush3.bf16.msra.mxu1 %v3410_v24  ;;  %3114 = vmatprep.mubr.bf16.mxu1 %v3838_v16  ;;  %v3417_v16 = vld [vmem:[#allocation8 + $0x200] sm:$0xff]  }
 0x1be   : > { %3160 = vmatprep.subr.bf16.mxu1 %v3411_v26 }
 0x1c1   : > { %3147 = vmatmul.mubr.bf16.gmra.mxu0 %v3842_v18  ;;  %3161 = vmatpush3.bf16.msra.mxu1 %v3411_v26  ;;  %v3418_v18 = vld [vmem:[#allocation9 + $0x38] sm:$0xff]  }
 0x1c2   : > { %3150 = vmatprep.mubr.bf16.mxu0 %v3844_v20  ;;  %3162 = vmatprep.subr.bf16.mxu1 %v3412_v36 }
 0x1c3   : > { %3190 = vmatprep.subr.bf16.mxu0 %v3418_v18 }
 0x1c4   : > { %3115 = vmatmul.mubr.bf16.gmra.mxu1 %v3850_v23  ;;  %3191 = vmatpush3.bf16.msra.mxu0 %v3418_v18  ;;  %v3419_v23 = vld [vmem:[#allocation9 + $0x30] sm:$0xff]  }
 0x1c5   : > { %3163 = vmatpush3.bf16.msra.mxu1 %v3412_v36  ;;  %3118 = vmatprep.mubr.bf16.mxu1 %v3847_v21 }
 0x1c6   : > { %3164 = vmatprep.subr.bf16.mxu1 %v3413_v6  ;;  %3192 = vmatprep.subr.bf16.mxu0 %v3419_v23 }
 0x1c8   : > { %3193 = vmatpush3.bf16.msra.mxu0 %v3419_v23 }
 0x1c9   : > { %3151 = vmatmul.mubr.bf16.gmra.mxu0 %v3854_v25  ;;  %3165 = vmatpush3.bf16.msra.mxu1 %v3413_v6  ;;  %v1238_v6 = vlaneseq }
 0x1ca   : > { %3154 = vmatprep.mubr.bf16.mxu0 %v3856_v28  ;;  %3166 = vmatprep.subr.bf16.mxu1 %v3414_v9 }
 0x1cb   : > { %3194 = vmatprep.subr.bf16.mxu0 %v3420_v32 }
 0x1cc   : > { %3119 = vmatmul.mubr.bf16.gmra.mxu1 %v3860_v29  ;;  %3195 = vmatpush3.bf16.msra.mxu0 %v3420_v32 }
 0x1cd   : > { %3167 = vmatpush3.bf16.msra.mxu1 %v3414_v9  ;;  %3122 = vmatprep.mubr.bf16.mxu1 %v3862_v31 }
 0x1ce   : > { %3168 = vmatprep.subr.bf16.mxu1 %v3415_v13  ;;  %3196 = vmatprep.subr.bf16.mxu0 %v3421_v40 }
 0x1d0   : > { %3197 = vmatpush3.bf16.msra.mxu0 %v3421_v40 }
 0x1d1   : > { %3155 = vmatmul.mubr.bf16.gmra.mxu0 %v3866_v33  ;;  %3169 = vmatpush3.bf16.msra.mxu1 %v3415_v13 }
 0x1d2   : > { %3170 = vmatprep.subr.bf16.mxu1 %v3416_v14  ;;  %3198 = vmatprep.subr.bf16.mxu0 %v3422_v47 }
 0x1d4   : > { %3123 = vmatmul.mubr.bf16.gmra.mxu1 %v3870_v37  ;;  %3199 = vmatpush3.bf16.msra.mxu0 %v3422_v47 }
 0x1d5   : > { %3171 = vmatpush3.bf16.msra.mxu1 %v3416_v14  ;;  %3174 = vmatprep.mubr.bf16.mxu1 %v3872_v39 }
 0x1d6   : > { %3172 = vmatprep.subr.bf16.mxu1 %v3417_v16  ;;  %3200 = vmatprep.subr.bf16.mxu0 %v3423_v54 }
 0x1d8   : > { %3201 = vmatpush3.bf16.msra.mxu0 %v3423_v54 }
 0x1d9   : > { %3173 = vmatpush3.bf16.msra.mxu1 %v3417_v16 }
 0x1da   : > { %3214 = vmatprep.subr.bf16.mxu1 %v3418_v18 }
 0x1dc   : > { %3175 = vmatmul.mubr.bf16.vlgmr.msra.gmra.mxu1 %v3878_v43 }
 0x1dd   : > { %3178 = vmatprep.mubr.bf16.mxu1 %v3880_v45  ;;  %3222 = vmatpush3.bf16.msra.mxu1 %v3418_v18 }
 0x1de   : > { %3215 = vmatprep.subr.bf16.mxu1 %v3419_v23 }
 0x1e1   : > { %3223 = vmatpush3.bf16.msra.mxu1 %v3419_v23 }
 0x1e2   : > { %3216 = vmatprep.subr.bf16.mxu1 %v3420_v32 }
 0x1e4   : > { %3179 = vmatmul.mubr.bf16.gmra.mxu1 %v3886_v49 }
 0x1e5   : > { %3182 = vmatprep.mubr.bf16.mxu1 %v3888_v51  ;;  %3224 = vmatpush3.bf16.msra.mxu1 %v3420_v32 }
 0x1e6   : > { %3217 = vmatprep.subr.bf16.mxu1 %v3421_v40 }
 0x1e9   : > { %3225 = vmatpush3.bf16.msra.mxu1 %v3421_v40 }
 0x1ea   : > { %3218 = vmatprep.subr.bf16.mxu1 %v3422_v47 }
 0x1ec   : > { %3183 = vmatmul.mubr.bf16.gmra.mxu1 %v3894_v55 }
 0x1ed   : > { %3186 = vmatprep.mubr.bf16.mxu1 %v3896_v57  ;;  %3226 = vmatpush3.bf16.msra.mxu1 %v3422_v47 }
 0x1ee   : > { %3219 = vmatprep.subr.bf16.mxu1 %v3423_v54 }
 0x1f1   : > { %3227 = vmatpush3.bf16.msra.mxu1 %v3423_v54 }
 0x1f4   : > { %3187 = vmatmul.mubr.bf16.gmra.mxu1 %v3900_v61  ;;  %v3424_v61 = vld [vmem:[#allocation9 + $0x8] sm:$0xff]  }
 0x1f5   : > { %3202 = vmatprep.subr.bf16.mxu0 %v3424_v61  ;;  %3220 = vmatprep.subr.bf16.mxu1 %v3424_v61 }
 0x1f6   : > { %3203 = vmatpush3.bf16.msra.mxu0 %v3424_v61  ;;  %3228 = vmatpush3.bf16.msra.mxu1 %v3424_v61 }
 0x1f7   : > { %3204 = vmatprep.subr.bf16.mxu0 %v3425_v4  ;;  %3221 = vmatprep.subr.bf16.mxu1 %v3425_v4 }
 0x1fa   : > { %3205 = vmatpush3.bf16.msra.mxu0 %v3425_v4  ;;  %3229 = vmatpush3.bf16.msra.mxu1 %v3425_v4 }
 0x219   : > { %v2952_v20 = vpop.f32.mrf.mxu0 }
 0x21b   : > { %v933_v21 = vpop.f32.mrf.mxu0 }
 0x21c   : > { %v2920_v25 = vpop.f32.mrf.mxu1 }
 0x21d   : > { %v3944_v27 = vadd.f32 %v2952_v20, %v2920_v25  ;;  %v2953_v28 = vpop.f32.mrf.mxu0 }
 0x21e   : > { %v740_v29 = vpop.f32.mrf.mxu1 }
 0x21f   : > { %v3946_v30 = vadd.f32 %v933_v21, %v740_v29  ;;  %v936_v31 = vpop.f32.mrf.mxu0  ;;  %v3984_v21 = vshrl.u32 %v1238_v6, 7 }
 0x220   : > { %v2921_v33 = vpop.f32.mrf.mxu1 }
 0x221   : > { %v3948_v34 = vadd.f32 %v2953_v28, %v2921_v33  ;;  %v2956_v35 = vpop.f32.mrf.mxu0  ;;  %vm1240_vm0 = vcmp.lt.s32.totalorder %v3984_v21, 1  ;;  %vm2245_vm1 = vcmp.lt.s32.totalorder %v3984_v21, 7 }
 0x222   : > { %v743_v37 = vpop.f32.mrf.mxu1 }
 0x223   : > { %v3950_v38 = vadd.f32 %v936_v31, %v743_v37  ;;  %v949_v39 = vpop.f32.mrf.mxu0 }
 0x224   : > { %v2924_v41 = vpop.f32.mrf.mxu1 }
 0x225   : > { %v3952_v42 = vadd.f32 %v2956_v35, %v2924_v41  ;;  %v2957_v43 = vpop.f32.mrf.mxu0 }
 0x226   : > { %v756_v44 = vpop.f32.mrf.mxu1 }
 0x227   : > { %v3954_v45 = vadd.f32 %v949_v39, %v756_v44  ;;  %v952_v46 = vpop.f32.mrf.mxu0 }
 0x228   : > { %v2925_v48 = vpop.f32.mrf.mxu1 }
 0x229   : > { %v3956_v49 = vadd.f32 %v2957_v43, %v2925_v48  ;;  %v2960_v50 = vpop.f32.mrf.mxu0 }
 0x22a   : > { %v759_v51 = vpop.f32.mrf.mxu1 }
 0x22b   : > { %v3958_v52 = vadd.f32 %v952_v46, %v759_v51  ;;  %v965_v53 = vpop.f32.mrf.mxu0 }
 0x22c   : > { %v2928_v55 = vpop.f32.mrf.mxu1 }
 0x22d   : > { %v3960_v56 = vadd.f32 %v2960_v50, %v2928_v55  ;;  %v2961_v57 = vpop.f32.mrf.mxu0 }
 0x22e   : > { %v772_v58 = vpop.f32.mrf.mxu1 }
 0x22f   : > { %v3962_v59 = vadd.f32 %v965_v53, %v772_v58  ;;  %v968_v60 = vpop.f32.mrf.mxu0 }
 0x230   : > { %v2929_v62 = vpop.f32.mrf.mxu1 }
 0x231   : > { %v3964_v63 = vadd.f32 %v2961_v57, %v2929_v62  ;;  %v2964_v0 = vpop.f32.mrf.mxu0 }
 0x232   : > { %v775_v1 = vpop.f32.mrf.mxu1 }
 0x233   : > { %v3966_v2 = vadd.f32 %v968_v60, %v775_v1  ;;  %v981_v3 = vpop.f32.mrf.mxu0 }
 0x234   : > { %v2932_v5 = vpop.f32.mrf.mxu1 }
 0x235   : > { %v3968_v7 = vadd.f32 %v2964_v0, %v2932_v5  ;;  %v2965_v8 = vpop.f32.mrf.mxu0 }
 0x236   : > { %v788_v10 = vpop.f32.mrf.mxu1 }
 0x237   : > { %v3970_v11 = vadd.f32 %v981_v3, %v788_v10  ;;  %v984_v12 = vpop.f32.mrf.mxu0 }
 0x238   : > { %v2933_v15 = vpop.f32.mrf.mxu1 }
 0x239   : > { %v3972_v17 = vadd.f32 %v2965_v8, %v2933_v15  ;;  %v3974_v19 = vpop.f32.mrf.mxu0 }
 0x23a   : > { %v791_v22 = vpop.f32.mrf.mxu1 }
 0x23b   : > { %v3976_v24 = vadd.f32 %v984_v12, %v791_v22  ;;  %v3978_v26 = vpop.f32.mrf.mxu0 }
 0x23c   : > { %v2984_v36 = vpop.f32.mrf.mxu1 }
 0x23d   : > { %v1208_v9 = vadd.f32 %v2984_v36, %v3944_v27  ;;  %v3017_v13 = vpop.f32.mrf.mxu0 }
 0x23e   : > { %v1143_v14 = vpop.f32.mrf.mxu1 }
 0x23f   : > { %v3982_v16 = vadd.f32 %v1143_v14, %v3946_v30  ;;  %v1368_v18 = vpop.f32.mrf.mxu0  ;;  %v1224_v27 = vrot.slane %v1208_v9, 7 }
 0x240   : > { %v2985_v20 = vpop.f32.mrf.mxu1 }
 0x241   : > { %v1209_v23 = vadd.f32 %v2985_v20, %v3948_v34  ;;  %v3987_v25 = vpop.f32.mrf.mxu0 }
 0x242   : > { %v1146_v28 = vpop.f32.mrf.mxu1 }
 0x243   : > { %v1207_v29 = vadd.f32 %v1146_v28, %v3950_v38  ;;  %v3990_v31 = vpop.f32.mrf.mxu0  ;;  %v1225_v43 = vrot.slane %v1209_v23, 7  ;;  %v1222_v23 = vrot.slane %v3982_v16, 7 }
 0x244   : > { %v2988_v32 = vpop.f32.mrf.mxu1 }
 0x245   : > { %v1223_v33 = vrot.slane %v1207_v29, 7  ;;  %v1212_v30 = vadd.f32 %v2988_v32, %v3952_v42  ;;  %v3021_v35 = vpop.f32.mrf.mxu0 }
 0x246   : > { %v1159_v37 = vpop.f32.mrf.mxu1 }
 0x247   : > { %v1210_v39 = vadd.f32 %v1159_v37, %v3954_v45  ;;  %v1382_v40 = vpop.f32.mrf.mxu0  ;;  %v1247_v34 = vsel %vm1240_vm0, %v1223_v33, %v1224_v27  ;;  %v1228_v51 = vrot.slane %v1212_v30, 7 }
 0x248   : > { %v2989_v41 = vpop.f32.mrf.mxu1 }
 0x249   : > { %v1226_v38 = vrot.slane %v1210_v39, 7  ;;  %v1213_v44 = vadd.f32 %v2989_v41, %v3956_v49  ;;  %v3998_v46 = vpop.f32.mrf.mxu0 }
 0x24a   : > { %v1162_v47 = vpop.f32.mrf.mxu1 }
 0x24b   : > { %v1211_v48 = vadd.f32 %v1162_v47, %v3958_v52  ;;  %v4001_v50 = vpop.f32.mrf.mxu0  ;;  %v4005_v42 = vsel %vm1240_vm0, %v1225_v43, %v1226_v38  ;;  %v1229_v61 = vrot.slane %v1213_v44, 7 }
 0x24c   : > { %v2992_v45 = vpop.f32.mrf.mxu1 }
 0x24d   : > { %v1227_v53 = vrot.slane %v1211_v48, 7  ;;  %v1216_v54 = vadd.f32 %v2992_v45, %v3960_v56  ;;  %v3025_v55 = vpop.f32.mrf.mxu0 }
 0x24e   : > { %v1175_v57 = vpop.f32.mrf.mxu1 }
 0x24f   : > { %v1214_v49 = vadd.f32 %v1175_v57, %v3962_v59  ;;  %v1396_v58 = vpop.f32.mrf.mxu0  ;;  %v1245_v60 = vsel %vm1240_vm0, %v1227_v53, %v1228_v51  ;;  %v1232_v8 = vrot.slane %v1216_v54, 7 }
 0x250   : > { %v2993_v52 = vpop.f32.mrf.mxu1 }
 0x251   : > { %v1230_v62 = vrot.slane %v1214_v49, 7  ;;  %v1217_v0 = vadd.f32 %v2993_v52, %v3964_v63  ;;  %v4012_v1 = vpop.f32.mrf.mxu0 }
 0x252   : > { %v1178_v3 = vpop.f32.mrf.mxu1 }
 0x253   : > { %v1215_v4 = vadd.f32 %v1178_v3, %v3966_v2  ;;  %v4015_v5 = vpop.f32.mrf.mxu0  ;;  %v4019_v56 = vsel %vm1240_vm0, %v1229_v61, %v1230_v62  ;;  %v1233_v9 = vrot.slane %v1217_v0, 7 }
 0x254   : > { %v2996_v59 = vpop.f32.mrf.mxu1 }
 0x255   : > { %v1231_v10 = vrot.slane %v1215_v4, 7  ;;  %v1220_v12 = vadd.f32 %v2996_v59, %v3968_v7  ;;  %v3029_v15 = vpop.f32.mrf.mxu0 }
 0x256   : > { %v1191_v22 = vpop.f32.mrf.mxu1 }
 0x257   : > { %v1218_v63 = vadd.f32 %v1191_v22, %v3970_v11  ;;  %v1410_v36 = vpop.f32.mrf.mxu0  ;;  %v1243_v6 = vsel %vm1240_vm0, %v1231_v10, %v1232_v8  ;;  %v1236_v27 = vrot.slane %v1220_v12, 7 }
 0x258   : > { %v2997_v2 = vpop.f32.mrf.mxu1 }
 0x259   : > { %v1234_v13 = vrot.slane %v1218_v63, 7  ;;  %v1221_v14 = vadd.f32 %v2997_v2, %v3972_v17  ;;  %v3080_v18 = vpop.f32.mrf.mxu0 }
 0x25a   : > { %v1194_v20 = vpop.f32.mrf.mxu1 }
 0x25b   : > { %v1237_v28 = vrot.slane %v1221_v14, 7  ;;  %v1219_v7 = vadd.f32 %v1194_v20, %v3976_v24  ;;  %v1656_v29 = vpop.f32.mrf.mxu0  ;;  %v1242_v11 = vsel %vm1240_vm0, %v1233_v9, %v1234_v13 }
 0x25c   : > { %v3048_v32 = vpop.f32.mrf.mxu1 }
 0x25d   : > { %v1235_v33 = vrot.slane %v1219_v7, 7  ;;  %v1510_v30 = vadd.f32 %v3048_v32, %v3974_v19  ;;  %v3081_v35 = vpop.f32.mrf.mxu0  ;;  %v1248_v17 = vsel %vm1240_vm0, %v1237_v28, %v1222_v23 }
 0x25e   : > { %v1502_v37 = vpop.f32.mrf.mxu1 }
 0x25f   : > { %v1712_v39 = vadd.f32 %v3080_v18, %v1510_v30  ;;  %v1503_v16 = vadd.f32 %v1502_v37, %v3978_v26  ;;  %v1659_v40 = vpop.f32.mrf.mxu0  ;;  %v1241_v24 = vsel %vm1240_vm0, %v1235_v33, %v1236_v27 }
 0x260   : > { %v3049_v41 = vpop.f32.mrf.mxu1 }
 0x261   : > { %v4036_v43 = vadd.f32 %v1712_v39, %v1247_v34  ;;  %v1711_v38 = vadd.f32 %v1656_v29, %v1503_v16  ;;  %v3084_v44 = vpop.f32.mrf.mxu0 }
 0x262   : > { %v1505_v47 = vpop.f32.mrf.mxu1 }
 0x263   : > { %v4038_v48 = vadd.f32 %v1711_v38, %v1248_v17  ;;  %v1670_v19 = vpop.f32.mrf.mxu0 }
 0x264   : > { %v3052_v45 = vpop.f32.mrf.mxu1 }
 0x265   : > { %v1524_v51 = vadd.f32 %v3052_v45, %v3987_v25  ;;  %v3085_v53 = vpop.f32.mrf.mxu0 }
 0x266   : > { %v1516_v54 = vpop.f32.mrf.mxu1 }
 0x267   : > { %v1714_v55 = vadd.f32 %v3084_v44, %v1524_v51  ;;  %v1517_v26 = vadd.f32 %v1516_v54, %v3990_v31  ;;  %v1673_v57 = vpop.f32.mrf.mxu0 }
 0x268   : > { %v3053_v49 = vpop.f32.mrf.mxu1 }
 0x269   : > { %v4042_v58 = vadd.f32 %v1714_v55, %v1245_v60  ;;  %v1713_v34 = vadd.f32 %v1670_v19, %v1517_v26  ;;  %v3088_v52 = vpop.f32.mrf.mxu0 }
 0x26a   : > { %v1519_v61 = vpop.f32.mrf.mxu1 }
 0x26b   : > { %v4045_v62 = vadd.f32 %v1713_v34, %v4005_v42  ;;  %v1684_v0 = vpop.f32.mrf.mxu0 }
 0x26c   : > { %v3056_v3 = vpop.f32.mrf.mxu1 }
 0x26d   : > { %v1538_v4 = vadd.f32 %v3056_v3, %v3998_v46  ;;  %v3089_v25 = vpop.f32.mrf.mxu0 }
 0x26e   : > { %v1530_v59 = vpop.f32.mrf.mxu1 }
 0x26f   : > { %v1716_v8 = vadd.f32 %v3088_v52, %v1538_v4  ;;  %v1531_v10 = vadd.f32 %v1530_v59, %v4001_v50  ;;  %v1687_v31 = vpop.f32.mrf.mxu0 }
 0x270   : > { %v3057_v12 = vpop.f32.mrf.mxu1 }
 0x271   : > { %v4049_v15 = vadd.f32 %v1716_v8, %v1243_v6  ;;  %v1715_v60 = vadd.f32 %v1684_v0, %v1531_v10  ;;  %v3092_v22 = vpop.f32.mrf.mxu0 }
 0x272   : > { %v1533_v63 = vpop.f32.mrf.mxu1 }
 0x273   : > { %v4052_v36 = vadd.f32 %v1715_v60, %v4019_v56  ;;  %v1698_v42 = vpop.f32.mrf.mxu0 }
 0x274   : > { %v3060_v2 = vpop.f32.mrf.mxu1 }
 0x275   : > { %v1552_v9 = vadd.f32 %v3060_v2, %v4012_v1  ;;  %v3093_v46 = vpop.f32.mrf.mxu0 }
 0x276   : > { %v1544_v13 = vpop.f32.mrf.mxu1 }
 0x277   : > { %v1718_v14 = vadd.f32 %v3092_v22, %v1552_v9  ;;  %v1545_v18 = vadd.f32 %v1544_v13, %v4015_v5  ;;  %v1701_v50 = vpop.f32.mrf.mxu0  ;;  %v4078_v9 = vld [vmem:[%s4194_s5] ss:$0 sm:$0xff] }
 0x278   : > { %v3061_v20 = vpop.f32.mrf.mxu1 }
 0x279   : > { %v4056_v23 = vadd.f32 %v1718_v14, %v1241_v24  ;;  %v1717_v6 = vadd.f32 %v1698_v42, %v1545_v18  ;;  %v3144_v29 = vpop.f32.mrf.mxu0 }
 0x27a   : > { %v1547_v28 = vpop.f32.mrf.mxu1 }
 0x27b   : > { %v4058_v7 = vadd.f32 %v1717_v6, %v1242_v11  ;;  %v1988_v27 = vpop.f32.mrf.mxu0 }
 0x27c   : > { %v3112_v56 = vpop.f32.mrf.mxu1 }
 0x27d   : > { %v3145_v1 = vpop.f32.mrf.mxu0  ;;  %v1997_v26 = vadd.f32 %v3144_v29, %v3112_v56 }
 0x27e   : > { %v1843_v32 = vpop.f32.mrf.mxu1 }
 0x27f   : > { %v1991_v37 = vpop.f32.mrf.mxu0  ;;  %v1989_v49 = vadd.f32 %v1988_v27, %v1843_v32 }
 0x280   : > { %v3113_v33 = vpop.f32.mrf.mxu1 }
 0x281   : > { %v3148_v16 = vpop.f32.mrf.mxu0  ;;  %v2000_v34 = vadd.f32 %v3145_v1, %v3113_v33 }
 0x282   : > { %v1846_v30 = vpop.f32.mrf.mxu1 }
 0x283   : > { %v2004_v41 = vpop.f32.mrf.mxu0  ;;  %v1992_v3 = vadd.f32 %v1991_v37, %v1846_v30 }
 0x284   : > { %v3116_v35 = vpop.f32.mrf.mxu1 }
 0x285   : > { %v3149_v44 = vpop.f32.mrf.mxu0  ;;  %v2013_v22 = vadd.f32 %v3148_v16, %v3116_v35 }
 0x286   : > { %v1859_v17 = vpop.f32.mrf.mxu1 }
 0x287   : > { %v2007_v45 = vpop.f32.mrf.mxu0  ;;  %v2005_v14 = vadd.f32 %v2004_v41, %v1859_v17 }
 0x288   : > { %v3117_v39 = vpop.f32.mrf.mxu1 }
 0x289   : > { %v3152_v54 = vpop.f32.mrf.mxu0  ;;  %v2016_v18 = vadd.f32 %v3149_v44, %v3117_v39 }
 0x28a   : > { %v1862_v5 = vpop.f32.mrf.mxu1 }
 0x28b   : > { %v2020_v61 = vpop.f32.mrf.mxu0  ;;  %v2008_v32 = vadd.f32 %v2007_v45, %v1862_v5 }
 0x28c   : > { %v3120_v40 = vpop.f32.mrf.mxu1 }
 0x28d   : > { %v3153_v12 = vpop.f32.mrf.mxu0  ;;  %v2029_v44 = vadd.f32 %v3152_v54, %v3120_v40 }
 0x28e   : > { %v4060_v24 = vpop.f32.mrf.mxu1 }
 0x28f   : > { %v2023_v6 = vpop.f32.mrf.mxu0 }
 0x290   : > { %v3121_v38 = vpop.f32.mrf.mxu1 }
 0x291   : > { %v3156_v37 = vpop.f32.mrf.mxu0 }
 0x292   : > { %v4062_v11 = vpop.f32.mrf.mxu1 }
 0x294   : > { %v4064_v47 = vpop.f32.mrf.mxu1 }
 0x296   : > { %v4066_v19 = vpop.f32.mrf.mxu1 }
 0x298   : > { %v4068_v51 = vpop.f32.mrf.mxu1 }
 0x29a   : > { %v4070_v53 = vpop.f32.mrf.mxu1 }
 0x29c   : > { %v3176_v55 = vpop.f32.mrf.mxu1 }
 0x29d   : > { %v2215_v52 = vadd.f32 %v3176_v55, %v1997_v26 }
 0x29e   : > { %v2150_v57 = vpop.f32.mrf.mxu1 }
 0x29f   : > { %v2213_v4 = vadd.f32 %v2150_v57, %v1989_v49  ;;  %v2231_v8 = vrot.slane %v2215_v52, 1  ;;  %v2021_v49 = vadd.f32 %v2020_v61, %v4060_v24 }
 0x2a0   : > { %v3177_v0 = vpop.f32.mrf.mxu1 }
 0x2a1   : > { %v2216_v25 = vadd.f32 %v3177_v0, %v2000_v34  ;;  %v2229_v63 = vrot.slane %v2213_v4, 1  ;;  %v2032_v34 = vadd.f32 %v3153_v12, %v3121_v38 }
 0x2a2   : > { %v2153_v59 = vpop.f32.mrf.mxu1 }
 0x2a3   : > { %v2232_v10 = vrot.slane %v2216_v25, 1  ;;  %v2214_v31 = vadd.f32 %v2153_v59, %v1992_v3  ;;  %v2036_v3 = vpop.f32.mrf.mxu0  ;;  %v2024_v25 = vadd.f32 %v2023_v6, %v4062_v11 }
 0x2a4   : > { %v3180_v60 = vpop.f32.mrf.mxu1 }
 0x2a5   : > { %v2252_v42 = vsel %vm2245_vm1, %v2231_v8, %v2232_v10  ;;  %v2230_v2 = vrot.slane %v2214_v31, 1  ;;  %v2219_v20 = vadd.f32 %v3180_v60, %v2013_v22  ;;  %v3157_v31 = vpop.f32.mrf.mxu0 }
 0x2a6   : > { %v2255_v46 = vadd.f32 %v2252_v42, %v4036_v43  ;;  %v2166_v13 = vpop.f32.mrf.mxu1 }
 0x2a7   : > { %v2253_v50 = vsel %vm2245_vm1, %v2229_v63, %v2230_v2  ;;  %v2217_v27 = vadd.f32 %v2166_v13, %v2005_v14  ;;  %v2235_v43 = vrot.slane %v2219_v20, 1  ;;  %v2045_v63 = vadd.f32 %v3156_v37, %v4064_v47  ;;  %v2039_v6 = vpop.f32.mrf.mxu0 }
 0x2a8   : > { %v2254_v28 = vadd.f32 %v2253_v50, %v4038_v48  ;;  %v3181_v29 = vpop.f32.mrf.mxu1  ;;  %v2270_v56 = vadd.f32 %v4078_v9, %v2255_v46  ;;  %v2037_v14 = vadd.f32 %v2036_v3, %v4066_v19 }
 0x2a9   : > { %v2220_v33 = vadd.f32 %v3181_v29, %v2016_v18  ;;  %v2233_v55 = vrot.slane %v2217_v27, 1  ;;  %v2048_v18 = vadd.f32 %v3157_v31, %v4068_v51 }
 0x2aa   : > { %v2169_v30 = vpop.f32.mrf.mxu1  ;;  %v2269_v1 = vadd.f32 %v4078_v9, %v2254_v28  ;;  %v2278_v41 = vmax.f32 %v2270_v56, 0.0  ;;  %v2040_v56 = vadd.f32 %v2039_v6, %v4070_v53 }
 0x2ab   : > { %v2236_v35 = vrot.slane %v2220_v33, 1  ;;  %v2218_v17 = vadd.f32 %v2169_v30, %v2008_v32 }
 0x2ac   : > { %v3184_v39 = vpop.f32.mrf.mxu1  ;;  %v2277_v16 = vmax.f32 %v2269_v1, 0.0 }
 0x2ad   : > { %v2250_v48 = vsel %vm2245_vm1, %v2235_v43, %v2236_v35  ;;  %v2234_v26 = vrot.slane %v2218_v17, 1  ;;  %v2223_v0 = vadd.f32 %v3184_v39, %v2029_v44 }
 0x2ae   : > { %v2257_v5 = vadd.f32 %v2250_v48, %v4042_v58  ;;  %v2182_v45 = vpop.f32.mrf.mxu1  ;;  %v2285_v57 = vpack.c.bf16 %v2278_v41, %v2277_v16 }
 0x2af   : > { %v2251_v52 = vsel %vm2245_vm1, %v2233_v55, %v2234_v26  ;;  %v2221_v59 = vadd.f32 %v2182_v45, %v2021_v49  ;;  %v2239_v24 = vrot.slane %v2223_v0, 1  ;;  %v2425_v49 = vld [vmem:[%s3799_s19] sm:$0xff]  ;;  %v2428_v0 = vld [vmem:[%s3799_s19 + $0x18] sm:$0xff] }
 0x2b0   : > { %v2272_v4 = vadd.f32 %v4078_v9, %v2257_v5  ;;  %v2256_v40 = vadd.f32 %v2251_v52, %v4045_v62  ;;  %v3185_v54 = vpop.f32.mrf.mxu1  ;;  %3206 = vmatprep.mubr.bf16.mxu0 %v2285_v57  ;;  %v2427_v5 = vld [vmem:[%s3799_s19 + $0x10] sm:$0xff] }
 0x2b1   : > { %v2224_v58 = vadd.f32 %v3185_v54, %v2032_v34  ;;  %v2237_v42 = vrot.slane %v2221_v59, 1  ;;  %v2426_v54 = vld [vmem:[%s3799_s19 + $0x8] sm:$0xff] }
 0x2b2   : > { %v2271_v8 = vadd.f32 %v4078_v9, %v2256_v40  ;;  %v2185_v10 = vpop.f32.mrf.mxu1  ;;  %v2280_v12 = vmax.f32 %v2272_v4, 0.0 }
 0x2b3   : > { %v2240_v38 = vrot.slane %v2224_v58, 1  ;;  %v2222_v61 = vadd.f32 %v2185_v10, %v2024_v25 }
 0x2b4   : > { %v2279_v60 = vmax.f32 %v2271_v8, 0.0  ;;  %v3188_v22 = vpop.f32.mrf.mxu1 }
 0x2b5   : > { %v2248_v62 = vsel %vm2245_vm1, %v2239_v24, %v2240_v38  ;;  %v2238_v2 = vrot.slane %v2222_v61, 1  ;;  %v2227_v20 = vadd.f32 %v3188_v22, %v2045_v63  ;;  %v2431_v61 = vld [vmem:[%s3799_s19 + $0x30] sm:$0xff] }
 0x2b6   : > { %v2286_v11 = vpack.c.bf16 %v2280_v12, %v2279_v60  ;;  %v2259_v46 = vadd.f32 %v2248_v62, %v4049_v15  ;;  %v2198_v13 = vpop.f32.mrf.mxu1  ;;  %v2429_v60 = vld [vmem:[%s3799_s19 + $0x20] sm:$0xff]  ;;  %v2432_v62 = vld [vmem:[%s3799_s19 + $0x38] sm:$0xff] }
 0x2b7   : > { %v2249_v50 = vsel %vm2245_vm1, %v2237_v42, %v2238_v2  ;;  %v2225_v32 = vadd.f32 %v2198_v13, %v2037_v14  ;;  %v2243_v33 = vrot.slane %v2227_v20, 1  ;;  %v2430_v14 = vld [vmem:[%s3799_s19 + $0x28] sm:$0xff]  ;;  %s3532_s19 = scalar_lea.vmem %s4138_s29, 1024 }
 0x2b8   : > { %v2258_v47 = vadd.f32 %v2249_v50, %v4052_v36  ;;  %v3189_v28 = vpop.f32.mrf.mxu1  ;;  %3207 = vmatmul.mubr.bf16.vlgmr.msra.gmra.mxu0 %v2286_v11  ;;  %v2274_v29 = vadd.f32 %v4078_v9, %v2259_v46  ;;  %p3533_p4 = scmp.ne.s32.totalorder %s4138_s29, %s3532_s19  ;;  %p3540_p3 = scmp.lt.s32.totalorder %s3538_s9, %s3532_s19 }
 0x2b9   : > { %v2228_v15 = vadd.f32 %v3189_v28, %v2048_v18  ;;  %v2241_v35 = vrot.slane %v2225_v32, 1 }
 0x2ba   : > { %v2201_v27 = vpop.f32.mrf.mxu1  ;;  %v2273_v19 = vadd.f32 %v4078_v9, %v2258_v47  ;;  %v2282_v43 = vmax.f32 %v2274_v29, 0.0  ;;  %p3534_p12 = pnand %p3533_p4, %p4216_p6  ;;  %p3541_p7 = por %p3540_p3, %p3539_p5 }
 0x2bb   : > { %v2244_v51 = vrot.slane %v2228_v15, 1  ;;  %v2226_v30 = vadd.f32 %v2201_v27, %v2040_v56 }
 0x2bc   : > { %v2281_v1 = vmax.f32 %v2273_v19, 0.0  ;;  %p3535_p0 = pneg %p3534_p12 }
 0x2bd   : > { %v2246_v36 = vsel %vm2245_vm1, %v2243_v33, %v2244_v51  ;;  %v2242_v17 = vrot.slane %v2226_v30, 1 }
 0x2be   : > { %v2261_v37 = vadd.f32 %v2246_v36, %v4056_v23  ;;  %v2287_v53 = vpack.c.bf16 %v2282_v43, %v2281_v1  ;;  %v2694_v23 = vld [vmem:[%s4195_s6] ss:$0 sm:$0xff]  ;;  %p3542_p9 = pnand %p3541_p7, %p3535_p0 }
 0x2bf   : > { %v2247_v39 = vsel %vm2245_vm1, %v2241_v35, %v2242_v17 }
 0x2c0   : > { %v2276_v16 = vadd.f32 %v4078_v9, %v2261_v37  ;;  %v2260_v41 = vadd.f32 %v2247_v39, %v4058_v7  ;;  %3210 = vmatprep.mubr.bf16.mxu1 %v2287_v53 }
 0x2c2   : > { %v2275_v44 = vadd.f32 %v4078_v9, %v2260_v41  ;;  %v2284_v55 = vmax.f32 %v2276_v16, 0.0 }
 0x2c4   : > { %v2283_v48 = vmax.f32 %v2275_v44, 0.0 }
 0x2c6   : > { %v2288_v26 = vpack.c.bf16 %v2284_v55, %v2283_v48 }
 0x2c8   : > { %3211 = vmatmul.mubr.bf16.vlgmr.msra.gmra.mxu1 %v2288_v26 }
 0x378   : > { %v3208_v21 = vpop.f32.mrf.mxu0 }
 0x379   : > { %v2403_v45 = vadd.f32 %v3208_v21, %v2694_v23 }
 0x37a   : > { %v2394_v57 = vpop.f32.mrf.mxu0 }
 0x37b   : > { %v2435_v7 = vadd.f32 %v2427_v5, %v2403_v45  ;;  %v2395_v34 = vadd.f32 %v2694_v23, %v2394_v57 }
 0x37c   : > { %v3209_v52 = vpop.f32.mrf.mxu0 }
 0x37d   : > { %v2443_v9 = vmax.f32 %v2435_v7, 0.0  ;;  %v2433_v3 = vadd.f32 %v2425_v49, %v2395_v34  ;;  %v2406_v4 = vadd.f32 %v3209_v52, %v2694_v23 }
 0x37e   : > { %v2397_v40 = vpop.f32.mrf.mxu0 }
 0x37f   : > { %2451 = vst [vmem:[%s4125_s21 + $0x10] sm:$0xff] %v2443_v9  ;;  %v2441_v25 = vmax.f32 %v2433_v3, 0.0  ;;  %v2436_v59 = vadd.f32 %v2428_v0, %v2406_v4  ;;  %v2398_v58 = vadd.f32 %v2694_v23, %v2397_v40 }
 0x381   : > { %2449 = vst [vmem:[%s4125_s21] sm:$0xff] %v2441_v25  ;;  %v2444_v8 = vmax.f32 %v2436_v59, 0.0  ;;  %v2434_v10 = vadd.f32 %v2426_v54, %v2398_v58 }
 0x383   : > { %2452 = vst [vmem:[%s4125_s21 + $0x18] sm:$0xff] %v2444_v8  ;;  %v2442_v24 = vmax.f32 %v2434_v10, 0.0 }
 0x385   : > { %2450 = vst [vmem:[%s4125_s21 + $0x8] sm:$0xff] %v2442_v24 }
 0x388   : > { %v3212_v38 = vpop.f32.mrf.mxu1 }
 0x389   : > { %v2419_v31 = vadd.f32 %v3212_v38, %v2694_v23 }
 0x38a   : > { %v2410_v12 = vpop.f32.mrf.mxu1 }
 0x38b   : > { %v2439_v22 = vadd.f32 %v2431_v61, %v2419_v31  ;;  %v2411_v63 = vadd.f32 %v2694_v23, %v2410_v12 }
 0x38c   : > { %v3213_v42 = vpop.f32.mrf.mxu1 }
 0x38d   : > { %v2447_v2 = vmax.f32 %v2439_v22, 0.0  ;;  %v2437_v11 = vadd.f32 %v2429_v60, %v2411_v63  ;;  %v2422_v46 = vadd.f32 %v3213_v42, %v2694_v23 }
 0x38e   : > { %v2413_v13 = vpop.f32.mrf.mxu1 }
 0x38f   : > { %2455 = vst [vmem:[%s4125_s21 + $0x30] sm:$0xff] %v2447_v2  ;;  %v2445_v18 = vmax.f32 %v2437_v11, 0.0  ;;  %v2440_v50 = vadd.f32 %v2432_v62, %v2422_v46  ;;  %v2414_v20 = vadd.f32 %v2694_v23, %v2413_v13 }
 0x391   : > { %2453 = vst [vmem:[%s4125_s21 + $0x20] sm:$0xff] %v2445_v18  ;;  %v2448_v6 = vmax.f32 %v2440_v50, 0.0  ;;  %v2438_v47 = vadd.f32 %v2430_v14, %v2414_v20 }
 0x393   : > { %2456 = vst [vmem:[%s4125_s21 + $0x38] sm:$0xff] %v2448_v6  ;;  %v2446_v28 = vmax.f32 %v2438_v47, 0.0 }
 0x395   : > { %2454 = vst [vmem:[%s4125_s21 + $0x28] sm:$0xff] %v2446_v28 }
 0x396   : > { %3545 = shalt.err (!%p3542_p9)
}
 0x397   : > { %s3546_s23 = scalar_lea.hbm %s4144_s1, 1024  ;;  %s3550_s13 = scalar_lea.hbm %s4196_s7, 2048 }
 0x398   : > { %p3547_p1 = scmp.ne.s32.totalorder %s4144_s1, %s3546_s23  ;;  %p3551_p11 = scmp.lt.s32.totalorder %s4144_s1, %s4196_s7 }
 0x399   : > { %p3552_p13 = scmp.lt.s32.totalorder %s3550_s13, %s3546_s23 }
 0x39a   : > { %p3548_p8 = pnand %p3547_p1, %p4216_p6 }
 0x39b   : > { %p3553_p2 = por %p3552_p13, %p3551_p11 }
 0x39c   : > { %p3549_p10 = pneg %p3548_p8 }
 0x39e   : > { %p3554_p4 = pnand %p3553_p2, %p3549_p10 }
 0x3a0   : > { %3557 = shalt.err (!%p3554_p4)
}
 0x3a1   : > { %s3616_s15 = smov 128   ;;  %s3617_s22 = smov 8  }
 0x3a2   : > { %3244 = dma.vmem_to_hbm [thread:$0]  (%p4216_p6), %s4138_s29, 1024, %s4144_s1, %s2458_s18, %s3616_s15, %s3616_s15, %s3617_s22  }
 0x3a3 PF: > { %s2486_s19 = sand.u32 1, %s3592_s24   ;;  %p4217_p12 = scmp.ne.s32.totalorder %s4203_s8, 0 }
 0x3a4   : > { %p4218_p0 = scmp.ge.s32.totalorder %s3604_s27, 2  ;;  %s2487_s28 = scalar_lea.sflag [#allocation5], %s2486_s19 }
 0x3a6   : > { %p3261_p5 = pnand %p4218_p0, %p4217_p12 }
 0x3a8   : > { %p3262_p3 = pneg %p3261_p5 }
 0x3aa   : > { %3587 = dma.done.wait (%p3262_p3), %s2487_s28, 1024  }
 0x3ab   : > { %3589 = vsyncadd (%p3262_p3), %s2487_s28, 4294966272  ;;  %p22_p7 = scmp.ge.s32.totalorder %s3738_s14, 4   ;;  %s4219_s24 = smov %s3596_s25 }
 0x3ac   : > { %s4220_s25 = smov %s3600_s26  ;;  %s4221_s26 = smov %s3748_s17 }
 0x3ad   : > { %s4222_s27 = smov %s3738_s14  ;;  %24 = sbr.rel (!%p22_p7) target bundleno = 9 (0x9), region = 116 }
 0x3b2   :  { %2492 = vsyncpa [#allocation4], 1 }
 0x3b3   :  { %2494 = vsyncpa [#allocation4 + $0x1], 1 }
 0x3b4   :  { %2495 = vsyncpa [#allocation7], 1 }
 0x3b5   :  { %2496 = vsyncpa [#allocation10], 1 }
 0x3b6   :  { %2497 = vsyncpa [#allocation5], 1 }
 0x3b7   :  { %2499 = vsyncpa [#allocation5 + $0x1], 1 }

</bundles_post_ra>
